<compile_context>
chip_gen: v5e
topology: v5e:2x2
jax: 0.10.0
libtpu: 0.0.40
codegen_flags: <defaults>
</compile_context>

<pallas_src>
import jax
import jax.numpy as jnp
import numpy as np
from jax.experimental import pallas as pl
from jax.experimental.pallas import tpu as pltpu

# ----- small, module-consistent ViT configuration --------------------------
IMAGE_SIZE = (12, 20)      # pair(image_size); 12x20 / 4 -> 3*5 = 15 patches
PATCH = 4
CHANNELS = 4
DIM = 32                   # model dim
DEPTH = 2
HEADS = 4
DIM_HEAD = 8
INNER = HEADS * DIM_HEAD   # 32
NUM_CLASSES = 10
BATCH = 2
NUM_PATCHES = (IMAGE_SIZE[0] // PATCH) * (IMAGE_SIZE[1] // PATCH)  # 15
SEQ = NUM_PATCHES + 1      # 16 tokens (cls + patches) -> B*N = 32 (8-aligned)
PATCH_DIM = CHANNELS * PATCH * PATCH                               # 64

LN_EPS = 1e-5
STD_EPS = 1e-6             # robustness eps on the cross-head variance
NEG_BIG = -1e30            # additive mask value for cross-batch pairs


# ---------------------------------------------------------------------------
# Pallas kernel: depth x (LayerNorm + sphere attention + out-proj + residual)
# followed by the Transformer's final LayerNorm, one grid step per layer.
# ---------------------------------------------------------------------------
def _sphere_transformer_kernel(x_ref, sph_ref, mask_ref,
                               gamma_ref, beta_ref, wqkv_ref, wo_ref, bo_ref,
                               gf_ref, bf_ref,
                               o_ref, xcur_ref):
    layer = pl.program_id(0)
    n_layers = pl.num_programs(0)

    bn, d_pad = x_ref.shape                   # (B*N, 128)
    d = gamma_ref.shape[-1]                   # model dim (32)
    g3 = wqkv_ref.shape[1]                    # 3*H
    heads = g3 // 3
    dh = wqkv_ref.shape[-1]
    scale = dh ** (-0.5)

    # Load the residual stream into VMEM scratch on the first layer.
    @pl.when(layer == 0)
    def _():
        xcur_ref[...] = x_ref[...]

    x_full = xcur_ref[...]                    # (BN, Dpad); pad lanes stay 0
    x = x_full[:, :d]                         # (BN, D)

    gamma = gamma_ref[...][0]                 # (1, D)
    beta = beta_ref[...][0]                   # (1, D)
    wqkv = wqkv_ref[...][0]                   # (3H, D, DH)
    wo = wo_ref[...][0]                       # (H, DH, Dpad)
    bo = bo_ref[...][0]                       # (1, Dpad)

    # ---- LayerNorm over the feature dim (EUP rsqrt) -------------------------
    mu = jnp.mean(x, axis=-1, keepdims=True)
    xc = x - mu
    var = jnp.mean(xc * xc, axis=-1, keepdims=True)
    xn = xc * jax.lax.rsqrt(var + LN_EPS) * gamma + beta           # (BN, D)

    # ---- head-major qkv projection: one batched MXU contraction -------------
    xn_b = jnp.broadcast_to(xn[None, :, :], (g3, bn, d))
    qkv = jnp.einsum('gnc,gcd->gnd', xn_b, wqkv,
                     preferred_element_type=jnp.float32)           # (3H, BN, DH)
    q = qkv[:heads]
    k = qkv[heads:2 * heads]
    v = qkv[2 * heads:]

    # ---- batched dots, weighted by block-diagonal (1 + sph_dist) ------------
    dots = jnp.einsum('hnd,hmd->hnm', q, k,
                      preferred_element_type=jnp.float32) * scale  # (H, BN, BN)
    dots = dots * (1.0 + sph_ref[...])[None]

    # ---- cross-head mean / unbiased std (cheap leading-axis reduces) --------
    mean_h = jnp.mean(dots, axis=0, keepdims=True)
    dev = dots - mean_h
    var_h = jnp.sum(dev * dev, axis=0, keepdims=True) / (heads - 1)
    dn = dev * jax.lax.rsqrt(var_h + STD_EPS)

    # ---- mask cross-batch pairs, softmax with EUP reciprocal ----------------
    dn = jnp.where(mask_ref[...][None] > 0.0, dn, NEG_BIG)
    row_max = jnp.max(dn, axis=-1, keepdims=True)
    p = jnp.exp(dn - row_max)
    denom = jnp.sum(p, axis=-1, keepdims=True)
    attn = p * pl.reciprocal(denom, approx=True)
    # TODO(synk): attention dropout omitted (p=0.0 / eval mode -> identity).

    # ---- attn @ v, fused head-merge + output projection + residual ----------
    oh = jnp.einsum('hnm,hmd->hnd', attn, v,
                    preferred_element_type=jnp.float32)            # (H, BN, DH)
    out = jnp.einsum('hnd,hdc->hnc', oh, wo,
                     preferred_element_type=jnp.float32)           # (H, BN, Dpad)
    x_new = x_full + jnp.sum(out, axis=0) + bo                     # residual
    xcur_ref[...] = x_new

    # ---- final Transformer LayerNorm, fused on the last layer ---------------
    @pl.when(layer == n_layers - 1)
    def _():
        xs = x_new[:, :d]
        mu_f = jnp.mean(xs, axis=-1, keepdims=True)
        var_f = jnp.mean((xs - mu_f) ** 2, axis=-1, keepdims=True)
        o_ref[...] = ((x_new - mu_f) * jax.lax.rsqrt(var_f + LN_EPS)
                      * gf_ref[...] + bf_ref[...])


def sphere_transformer_pallas(x, sph_dist, lp, g_final, b_final, *, heads):
    """x: (B, N, D) -> LayerNorm(stack of GlobalSphereAttention + residual)."""
    b, n, d = x.shape
    bn = b * n
    depth, _, three_inner = lp['w_qkv'].shape
    dh = three_inner // (3 * heads)
    d_pad = ((d + 127) // 128) * 128

    # Lane-dense residual stream (pad lanes stay exactly zero in the kernel).
    x_pad = jnp.pad(x.reshape(bn, d).astype(jnp.float32),
                    ((0, 0), (0, d_pad - d)))

    # Block-diagonal spherical distance + same-batch mask over flattened B*N.
    eye_b = jnp.eye(b, dtype=jnp.float32)
    sph_big = jnp.kron(eye_b, sph_dist.astype(jnp.float32))        # (BN, BN)
    same_b = jnp.kron(eye_b, jnp.ones((n, n), jnp.float32))        # 1 = same batch

    # Head-major, depth-stacked weight layouts (one-time relayout in XLA).
    gamma = lp['gamma'].reshape(depth, 1, d)
    beta = lp['beta'].reshape(depth, 1, d)
    wqkv = lp['w_qkv'].reshape(depth, d, 3 * heads, dh).transpose(0, 2, 1, 3)
    wo = jnp.pad(lp['w_out'].reshape(depth, heads, dh, d),
                 ((0, 0), (0, 0), (0, 0), (0, d_pad - d)))
    bo = jnp.pad(lp['b_out'].reshape(depth, 1, d),
                 ((0, 0), (0, 0), (0, d_pad - d)))
    gf = jnp.pad(g_final.reshape(1, d), ((0, 0), (0, d_pad - d)))
    bf = jnp.pad(b_final.reshape(1, d), ((0, 0), (0, d_pad - d)))

    out_pad = pl.pallas_call(
        _sphere_transformer_kernel,
        out_shape=jax.ShapeDtypeStruct((bn, d_pad), jnp.float32),
        grid_spec=pltpu.PrefetchScalarGridSpec(
            num_scalar_prefetch=0,
            grid=(depth,),                      # one grid step per layer
            in_specs=[
                pl.BlockSpec((bn, d_pad), lambda l: (0, 0)),              # x_pad
                pl.BlockSpec((bn, bn), lambda l: (0, 0)),                 # sph_big
                pl.BlockSpec((bn, bn), lambda l: (0, 0)),                 # mask
                pl.BlockSpec((1, 1, d), lambda l: (l, 0, 0)),             # gamma_l
                pl.BlockSpec((1, 1, d), lambda l: (l, 0, 0)),             # beta_l
                pl.BlockSpec((1, 3 * heads, d, dh), lambda l: (l, 0, 0, 0)),   # w_qkv_l
                pl.BlockSpec((1, heads, dh, d_pad), lambda l: (l, 0, 0, 0)),   # w_out_l
                pl.BlockSpec((1, 1, d_pad), lambda l: (l, 0, 0)),         # b_out_l
                pl.BlockSpec((1, d_pad), lambda l: (0, 0)),               # final gamma
                pl.BlockSpec((1, d_pad), lambda l: (0, 0)),               # final beta
            ],
            out_specs=pl.BlockSpec((bn, d_pad), lambda l: (0, 0)),
            scratch_shapes=[pltpu.VMEM((bn, d_pad), jnp.float32)],
        ),
        compiler_params=pltpu.CompilerParams(
            dimension_semantics=("arbitrary",)),
    )(x_pad, sph_big, same_b, gamma, beta, wqkv, wo, bo, gf, bf)

    return out_pad[:, :d].reshape(b, n, d)


# ---------------------------------------------------------------------------
# ViT wrapper (patch embedding / cls / pos / pooling / head in plain XLA).
# ---------------------------------------------------------------------------
def _layer_norm(x, gamma, beta, eps=LN_EPS):
    mu = jnp.mean(x, axis=-1, keepdims=True)
    var = jnp.mean((x - mu) ** 2, axis=-1, keepdims=True)
    return (x - mu) * jax.lax.rsqrt(var + eps) * gamma + beta


def _patch_embed(img, params):
    b, c, hh, ww = img.shape
    p = PATCH
    h, w = hh // p, ww // p
    # Rearrange('b c (h p1) (w p2) -> b (h w) (p1 p2 c)')
    x = img.reshape(b, c, h, p, w, p).transpose(0, 2, 4, 3, 5, 1)
    x = x.reshape(b, h * w, p * p * c)
    x = _layer_norm(x, params['pe_ln1_g'], params['pe_ln1_b'])
    x = x @ params['pe_w'] + params['pe_b']
    x = _layer_norm(x, params['pe_ln2_g'], params['pe_ln2_b'])
    return x


def vit_forward(img, sph_dist, params):
    x = _patch_embed(img, params)
    b, n, d = x.shape
    cls = jnp.broadcast_to(params['cls_token'], (b, 1, d))
    x = jnp.concatenate([cls, x], axis=1)
    x = x + params['pos_emb'][:, :n + 1]
    # TODO(synk): embedding dropout omitted (p=0.0 / eval mode -> identity).
    x = sphere_transformer_pallas(x, sph_dist, params['layers'],
                                  params['tr_ln_g'], params['tr_ln_b'],
                                  heads=HEADS)
    x = x[:, 0]                                  # 'cls' pooling
    return x @ params['head_w'] + params['head_b']


vit_forward_jit = jax.jit(vit_forward)


# ---------------------------------------------------------------------------
# Pure-JAX reference (replicates the PyTorch forward) for correctness check.
# ---------------------------------------------------------------------------
def _attention_ref(x, sph_dist, gamma, beta, w_qkv, w_out, b_out, heads):
    dh = w_qkv.shape[-1] // (3 * heads)
    xn = _layer_norm(x, gamma, beta)
    qkv = xn @ w_qkv
    q, k, v = jnp.split(qkv, 3, axis=-1)

    def to_heads(t):
        b, n, _ = t.shape
        return t.reshape(b, n, heads, dh).transpose(0, 2, 1, 3)

    q, k, v = map(to_heads, (q, k, v))
    dots = jnp.einsum('bhnd,bhmd->bhnm', q, k) * (dh ** -0.5)
    dots = dots * (1.0 + sph_dist[None, None])
    mean_h = jnp.mean(dots, axis=1, keepdims=True)
    std_h = jnp.sqrt(jnp.sum((dots - mean_h) ** 2, axis=1, keepdims=True)
                     / (heads - 1))
    attn = jax.nn.softmax((dots - mean_h) / std_h, axis=-1)
    out = jnp.einsum('bhnm,bhmd->bhnd', attn, v)
    b, _, n, _ = out.shape
    out = out.transpose(0, 2, 1, 3).reshape(b, n, heads * dh)
    return out @ w_out + b_out


def vit_forward_ref(img, sph_dist, params):
    x = _patch_embed(img, params)
    b, n, d = x.shape
    cls = jnp.broadcast_to(params['cls_token'], (b, 1, d))
    x = jnp.concatenate([cls, x], axis=1)
    x = x + params['pos_emb'][:, :n + 1]
    lp = params['layers']
    for l in range(lp['gamma'].shape[0]):
        x = _attention_ref(x, sph_dist, lp['gamma'][l], lp['beta'][l],
                           lp['w_qkv'][l], lp['w_out'][l], lp['b_out'][l],
                           HEADS) + x
    x = _layer_norm(x, params['tr_ln_g'], params['tr_ln_b'])
    x = x[:, 0]
    return x @ params['head_w'] + params['head_b']


# ---------------------------------------------------------------------------
def init_params(key):
    keys = jax.random.split(key, 14)

    def nrm(k, shape, scale=1.0):
        return jax.random.normal(k, shape, jnp.float32) * scale

    params = {
        'pe_ln1_g': 1.0 + 0.1 * nrm(keys[0], (PATCH_DIM,)),
        'pe_ln1_b': 0.05 * nrm(keys[1], (PATCH_DIM,)),
        'pe_w': nrm(keys[2], (PATCH_DIM, DIM), PATCH_DIM ** -0.5),
        'pe_b': 0.02 * nrm(keys[3], (DIM,)),
        'pe_ln2_g': 1.0 + 0.1 * nrm(keys[4], (DIM,)),
        'pe_ln2_b': 0.05 * nrm(keys[5], (DIM,)),
        'cls_token': 0.02 * nrm(keys[6], (1, 1, DIM)),
        'pos_emb': 0.02 * nrm(keys[7], (1, NUM_PATCHES + 1, DIM)),
        'tr_ln_g': 1.0 + 0.1 * nrm(keys[8], (DIM,)),
        'tr_ln_b': 0.05 * nrm(keys[9], (DIM,)),
        'head_w': nrm(keys[10], (DIM, NUM_CLASSES), DIM ** -0.5),
        'head_b': 0.02 * nrm(keys[11], (NUM_CLASSES,)),
    }
    lk = jax.random.split(keys[12], 5)
    params['layers'] = {
        'gamma': 1.0 + 0.1 * nrm(lk[0], (DEPTH, DIM)),
        'beta': 0.05 * nrm(lk[1], (DEPTH, DIM)),
        'w_qkv': nrm(lk[2], (DEPTH, DIM, 3 * INNER), DIM ** -0.5),
        'w_out': nrm(lk[3], (DEPTH, INNER, DIM), INNER ** -0.5),
        'b_out': 0.02 * nrm(lk[4], (DEPTH, DIM)),
    }
    return params


if __name__ == "__main__":
    key = jax.random.PRNGKey(0)
    k_img, k_sph, k_par = jax.random.split(key, 3)

    img = jax.random.normal(k_img, (BATCH, CHANNELS) + IMAGE_SIZE, jnp.float32)

    # symmetric "spherical distance" matrix (over all SEQ tokens) with zero diag
    sd = jax.random.uniform(k_sph, (SEQ, SEQ), dtype=jnp.float32)
    sph_dist = (sd + sd.T) * 0.5
    sph_dist = sph_dist * (1.0 - jnp.eye(SEQ, dtype=jnp.float32))

    params = init_params(k_par)

    logits = jax.block_until_ready(vit_forward_jit(img, sph_dist, params))
    ref = vit_forward_ref(img, sph_dist, params)
    np.testing.assert_allclose(np.asarray(logits), np.asarray(ref),
                               rtol=2e-2, atol=2e-2)

    print("KERNEL_OK")
</pallas_src>

<mosaic_0001>
module attributes {stable_mosaic.version = 11 : i64} {
  func.func @_sphere_transformer_kernel(%arg0: i32, %arg1: memref<32x128xf32, #tpu.memory_space<vmem>>, %arg2: memref<32x32xf32, #tpu.memory_space<vmem>>, %arg3: memref<32x32xf32, #tpu.memory_space<vmem>>, %arg4: memref<1x1x32xf32, #tpu.memory_space<vmem>>, %arg5: memref<1x1x32xf32, #tpu.memory_space<vmem>>, %arg6: memref<1x12x32x8xf32, #tpu.memory_space<vmem>>, %arg7: memref<1x4x8x128xf32, #tpu.memory_space<vmem>>, %arg8: memref<1x1x128xf32, #tpu.memory_space<vmem>>, %arg9: memref<1x128xf32, #tpu.memory_space<vmem>>, %arg10: memref<1x128xf32, #tpu.memory_space<vmem>>, %arg11: memref<32x128xf32, #tpu.memory_space<vmem>>, %arg12: memref<32x128xf32, #tpu.memory_space<vmem>>) attributes {dimension_semantics = [#tpu.dimension_semantics<arbitrary>], iteration_bounds = array<i64: 2>, scalar_prefetch = 0 : i64, scratch_operands = 1 : i64, tpu.core_type = #tpu.core_type<tc>, window_params = [{pipeline_mode = #tpu.pipeline_mode<synchronous>, transform_indices = @transform_0, window_bounds = array<i64: 32, 128>}, {pipeline_mode = #tpu.pipeline_mode<synchronous>, transform_indices = @transform_1, window_bounds = array<i64: 32, 32>}, {pipeline_mode = #tpu.pipeline_mode<synchronous>, transform_indices = @transform_2, window_bounds = array<i64: 32, 32>}, {transform_indices = @transform_3, window_bounds = array<i64: 1, 1, 32>}, {transform_indices = @transform_4, window_bounds = array<i64: 1, 1, 32>}, {transform_indices = @transform_5, window_bounds = array<i64: 1, 12, 32, 8>}, {transform_indices = @transform_6, window_bounds = array<i64: 1, 4, 8, 128>}, {transform_indices = @transform_7, window_bounds = array<i64: 1, 1, 128>}, {pipeline_mode = #tpu.pipeline_mode<synchronous>, transform_indices = @transform_8, window_bounds = array<i64: 1, 128>}, {pipeline_mode = #tpu.pipeline_mode<synchronous>, transform_indices = @transform_9, window_bounds = array<i64: 1, 128>}, {pipeline_mode = #tpu.pipeline_mode<synchronous>, transform_indices = @transform_10, window_bounds = array<i64: 32, 128>}]} {
    %c0_i32 = arith.constant 0 : i32
    %0 = arith.cmpi eq, %arg0, %c0_i32 : i32
    %1 = arith.extui %0 : i1 to i32
    %c0_i32_0 = arith.constant 0 : i32
    %2 = arith.cmpi ne, %1, %c0_i32_0 : i32
    scf.if %2 {
      %c0_46 = arith.constant 0 : index
      %c0_47 = arith.constant 0 : index
      %95 = vector.load %arg1[%c0_46, %c0_47] : memref<32x128xf32, #tpu.memory_space<vmem>>, vector<32x128xf32>
      %c0_48 = arith.constant 0 : index
      %c0_49 = arith.constant 0 : index
      %96 = vector.load %arg12[%c0_48, %c0_49] : memref<32x128xf32, #tpu.memory_space<vmem>>, vector<32x128xf32>
      tpu.vector_store %arg12[%c0_48, %c0_49], %95 {strides = array<i32>} : memref<32x128xf32, #tpu.memory_space<vmem>>, vector<32x128xf32>,
    } else {
    }
    %c0 = arith.constant 0 : index
    %c0_1 = arith.constant 0 : index
    %3 = vector.load %arg12[%c0, %c0_1] : memref<32x128xf32, #tpu.memory_space<vmem>>, vector<32x128xf32>
    %4 = vector.extract_strided_slice %3 {offsets = [0, 0], sizes = [32, 32], strides = [1, 1]} : vector<32x128xf32> to vector<32x32xf32>
    %c0_2 = arith.constant 0 : index
    %c0_3 = arith.constant 0 : index
    %c0_4 = arith.constant 0 : index
    %5 = vector.load %arg4[%c0_2, %c0_3, %c0_4] : memref<1x1x32xf32, #tpu.memory_space<vmem>>, vector<1x1x32xf32>
    %6 = vector.shape_cast %5 : vector<1x1x32xf32> to vector<1x32xf32>
    %c0_5 = arith.constant 0 : index
    %c0_6 = arith.constant 0 : index
    %c0_7 = arith.constant 0 : index
    %7 = vector.load %arg5[%c0_5, %c0_6, %c0_7] : memref<1x1x32xf32, #tpu.memory_space<vmem>>, vector<1x1x32xf32>
    %8 = vector.shape_cast %7 : vector<1x1x32xf32> to vector<1x32xf32>
    %c0_8 = arith.constant 0 : index
    %c0_9 = arith.constant 0 : index
    %c0_10 = arith.constant 0 : index
    %c0_11 = arith.constant 0 : index
    %9 = vector.load %arg6[%c0_8, %c0_9, %c0_10, %c0_11] : memref<1x12x32x8xf32, #tpu.memory_space<vmem>>, vector<1x12x32x8xf32>
    %10 = vector.shape_cast %9 : vector<1x12x32x8xf32> to vector<12x32x8xf32>
    %c0_12 = arith.constant 0 : index
    %c0_13 = arith.constant 0 : index
    %c0_14 = arith.constant 0 : index
    %c0_15 = arith.constant 0 : index
    %11 = vector.load %arg7[%c0_12, %c0_13, %c0_14, %c0_15] : memref<1x4x8x128xf32, #tpu.memory_space<vmem>>, vector<1x4x8x128xf32>
    %12 = vector.shape_cast %11 : vector<1x4x8x128xf32> to vector<4x8x128xf32>
    %c0_16 = arith.constant 0 : index
    %c0_17 = arith.constant 0 : index
    %c0_18 = arith.constant 0 : index
    %13 = vector.load %arg8[%c0_16, %c0_17, %c0_18] : memref<1x1x128xf32, #tpu.memory_space<vmem>>, vector<1x1x128xf32>
    %14 = vector.shape_cast %13 : vector<1x1x128xf32> to vector<1x128xf32>
    %cst = arith.constant dense<0.000000e+00> : vector<32xf32>
    %15 = vector.multi_reduction <add>, %4, %cst [1] : vector<32x32xf32> to vector<32xf32>
    %16 = vector.shape_cast %15 : vector<32xf32> to vector<32x1xf32>
    %cst_19 = arith.constant 3.200000e+01 : f32
    %17 = vector.broadcast %cst_19 : f32 to vector<32x1xf32>
    %18 = arith.divf %16, %17 : vector<32x1xf32>
    %19 = vector.broadcast %18 : vector<32x1xf32> to vector<32x32xf32>
    %20 = arith.subf %4, %19 : vector<32x32xf32>
    %21 = arith.mulf %20, %20 : vector<32x32xf32>
    %cst_20 = arith.constant dense<0.000000e+00> : vector<32xf32>
    %22 = vector.multi_reduction <add>, %21, %cst_20 [1] : vector<32x32xf32> to vector<32xf32>
    %23 = vector.shape_cast %22 : vector<32xf32> to vector<32x1xf32>
    %cst_21 = arith.constant 3.200000e+01 : f32
    %24 = vector.broadcast %cst_21 : f32 to vector<32x1xf32>
    %25 = arith.divf %23, %24 : vector<32x1xf32>
    %cst_22 = arith.constant 9.99999974E-6 : f32
    %26 = vector.broadcast %cst_22 : f32 to vector<32x1xf32>
    %27 = arith.addf %25, %26 : vector<32x1xf32>
    %28 = math.rsqrt %27 : vector<32x1xf32>
    %29 = vector.broadcast %28 : vector<32x1xf32> to vector<32x32xf32>
    %30 = arith.mulf %20, %29 : vector<32x32xf32>
    %31 = vector.broadcast %6 : vector<1x32xf32> to vector<32x32xf32>
    %32 = arith.mulf %30, %31 : vector<32x32xf32>
    %33 = vector.broadcast %8 : vector<1x32xf32> to vector<32x32xf32>
    %34 = arith.addf %32, %33 : vector<32x32xf32>
    %35 = vector.shape_cast %34 : vector<32x32xf32> to vector<1x32x32xf32>
    %36 = vector.shape_cast %35 : vector<1x32x32xf32> to vector<1x32x32xf32>
    %37 = vector.broadcast %36 : vector<1x32x32xf32> to vector<12x32x32xf32>
    "tpu.trace_start"() <{level = 10 : i32, message = "gnc,gcd->gnd"}> : () -> ()
    %cst_23 = arith.constant dense<0.000000e+00> : vector<12x32x8xf32>
    %38 = tpu.matmul %37, %10, %cst_23 {dimension_numbers = #tpu.dot_dimension_numbers<[2], [1], [1], [2], [0, 0, 0, 1, 1, 2], [0], [0]>} : vector<12x32x32xf32>, vector<12x32x8xf32>, vector<12x32x8xf32> -> vector<12x32x8xf32>
    "tpu.trace_stop"() : () -> ()
    %39 = vector.extract_strided_slice %38 {offsets = [0, 0, 0], sizes = [4, 32, 8], strides = [1, 1, 1]} : vector<12x32x8xf32> to vector<4x32x8xf32>
    %40 = vector.extract_strided_slice %38 {offsets = [4, 0, 0], sizes = [4, 32, 8], strides = [1, 1, 1]} : vector<12x32x8xf32> to vector<4x32x8xf32>
    %41 = vector.extract_strided_slice %38 {offsets = [8, 0, 0], sizes = [4, 32, 8], strides = [1, 1, 1]} : vector<12x32x8xf32> to vector<4x32x8xf32>
    "tpu.trace_start"() <{level = 10 : i32, message = "hnd,hmd->hnm"}> : () -> ()
    %cst_24 = arith.constant dense<0.000000e+00> : vector<4x32x32xf32>
    %42 = tpu.matmul %39, %40, %cst_24 {dimension_numbers = #tpu.dot_dimension_numbers<[2], [2], [1], [1], [0, 0, 0, 1, 1, 1], [0], [0]>} : vector<4x32x8xf32>, vector<4x32x8xf32>, vector<4x32x32xf32> -> vector<4x32x32xf32>
    "tpu.trace_stop"() : () -> ()
    %cst_25 = arith.constant 0.353553385 : f32
    %43 = vector.broadcast %cst_25 : f32 to vector<4x32x32xf32>
    %44 = arith.mulf %42, %43 : vector<4x32x32xf32>
    %c0_26 = arith.constant 0 : index
    %c0_27 = arith.constant 0 : index
    %45 = vector.load %arg2[%c0_26, %c0_27] : memref<32x32xf32, #tpu.memory_space<vmem>>, vector<32x32xf32>
    %cst_28 = arith.constant 1.000000e+00 : f32
    %46 = vector.broadcast %cst_28 : f32 to vector<32x32xf32>
    %47 = arith.addf %46, %45 : vector<32x32xf32>
    %48 = vector.shape_cast %47 : vector<32x32xf32> to vector<1x32x32xf32>
    %49 = vector.broadcast %48 : vector<1x32x32xf32> to vector<4x32x32xf32>
    %50 = arith.mulf %44, %49 : vector<4x32x32xf32>
    %cst_29 = arith.constant dense<0.000000e+00> : vector<32x32xf32>
    %51 = vector.multi_reduction <add>, %50, %cst_29 [0] : vector<4x32x32xf32> to vector<32x32xf32>
    %52 = vector.shape_cast %51 : vector<32x32xf32> to vector<1x32x32xf32>
    %cst_30 = arith.constant 4.000000e+00 : f32
    %53 = vector.broadcast %cst_30 : f32 to vector<1x32x32xf32>
    %54 = arith.divf %52, %53 : vector<1x32x32xf32>
    %55 = vector.broadcast %54 : vector<1x32x32xf32> to vector<4x32x32xf32>
    %56 = arith.subf %50, %55 : vector<4x32x32xf32>
    %57 = arith.mulf %56, %56 : vector<4x32x32xf32>
    %cst_31 = arith.constant dense<0.000000e+00> : vector<32x32xf32>
    %58 = vector.multi_reduction <add>, %57, %cst_31 [0] : vector<4x32x32xf32> to vector<32x32xf32>
    %59 = vector.shape_cast %58 : vector<32x32xf32> to vector<1x32x32xf32>
    %cst_32 = arith.constant 3.000000e+00 : f32
    %60 = vector.broadcast %cst_32 : f32 to vector<1x32x32xf32>
    %61 = arith.divf %59, %60 : vector<1x32x32xf32>
    %cst_33 = arith.constant 9.99999997E-7 : f32
    %62 = vector.broadcast %cst_33 : f32 to vector<1x32x32xf32>
    %63 = arith.addf %61, %62 : vector<1x32x32xf32>
    %64 = math.rsqrt %63 : vector<1x32x32xf32>
    %65 = vector.broadcast %64 : vector<1x32x32xf32> to vector<4x32x32xf32>
    %66 = arith.mulf %56, %65 : vector<4x32x32xf32>
    %c0_34 = arith.constant 0 : index
    %c0_35 = arith.constant 0 : index
    %67 = vector.load %arg3[%c0_34, %c0_35] : memref<32x32xf32, #tpu.memory_space<vmem>>, vector<32x32xf32>
    %68 = vector.shape_cast %67 : vector<32x32xf32> to vector<1x32x32xf32>
    %cst_36 = arith.constant 0.000000e+00 : f32
    %69 = vector.broadcast %cst_36 : f32 to vector<1x32x32xf32>
    %70 = arith.cmpf ogt, %68, %69 : vector<1x32x32xf32>
    %cst_37 = arith.constant -1.000000e+30 : f32
    %71 = vector.shape_cast %70 : vector<1x32x32xi1> to vector<1x32x32xi1>
    %72 = vector.broadcast %71 : vector<1x32x32xi1> to vector<4x32x32xi1>
    %73 = vector.broadcast %cst_37 : f32 to vector<4x32x32xf32>
    %74 = arith.select %72, %66, %73 : vector<4x32x32xi1>, vector<4x32x32xf32>
    %cst_38 = arith.constant dense<0xFF800000> : vector<4x32xf32>
    %75 = vector.multi_reduction <maximumf>, %74, %cst_38 [2] : vector<4x32x32xf32> to vector<4x32xf32>
    %76 = vector.shape_cast %75 : vector<4x32xf32> to vector<4x32x1xf32>
    %77 = vector.broadcast %76 : vector<4x32x1xf32> to vector<4x32x32xf32>
    %78 = arith.subf %74, %77 : vector<4x32x32xf32>
    %79 = math.exp %78 : vector<4x32x32xf32>
    %cst_39 = arith.constant dense<0.000000e+00> : vector<4x32xf32>
    %80 = vector.multi_reduction <add>, %79, %cst_39 [2] : vector<4x32x32xf32> to vector<4x32xf32>
    %81 = vector.shape_cast %80 : vector<4x32xf32> to vector<4x32x1xf32>
    %82 = tpu.reciprocal %81 {approx = true} : vector<4x32x1xf32> -> vector<4x32x1xf32>
    %83 = vector.broadcast %82 : vector<4x32x1xf32> to vector<4x32x32xf32>
    %84 = arith.mulf %79, %83 : vector<4x32x32xf32>
    "tpu.trace_start"() <{level = 10 : i32, message = "hnm,hmd->hnd"}> : () -> ()
    %cst_40 = arith.constant dense<0.000000e+00> : vector<4x32x8xf32>
    %85 = tpu.matmul %84, %41, %cst_40 {dimension_numbers = #tpu.dot_dimension_numbers<[2], [1], [1], [2], [0, 0, 0, 1, 1, 2], [0], [0]>} : vector<4x32x32xf32>, vector<4x32x8xf32>, vector<4x32x8xf32> -> vector<4x32x8xf32>
    "tpu.trace_stop"() : () -> ()
    "tpu.trace_start"() <{level = 10 : i32, message = "hnd,hdc->hnc"}> : () -> ()
    %cst_41 = arith.constant dense<0.000000e+00> : vector<4x32x128xf32>
    %86 = tpu.matmul %85, %12, %cst_41 {dimension_numbers = #tpu.dot_dimension_numbers<[2], [1], [1], [2], [0, 0, 0, 1, 1, 2], [0], [0]>} : vector<4x32x8xf32>, vector<4x8x128xf32>, vector<4x32x128xf32> -> vector<4x32x128xf32>
    "tpu.trace_stop"() : () -> ()
    %cst_42 = arith.constant dense<0.000000e+00> : vector<32x128xf32>
    %87 = vector.multi_reduction <add>, %86, %cst_42 [0] : vector<4x32x128xf32> to vector<32x128xf32>
    %88 = arith.addf %3, %87 : vector<32x128xf32>
    %89 = vector.broadcast %14 : vector<1x128xf32> to vector<32x128xf32>
    %90 = arith.addf %88, %89 : vector<32x128xf32>
    %c0_43 = arith.constant 0 : index
    %c0_44 = arith.constant 0 : index
    %91 = vector.load %arg12[%c0_43, %c0_44] : memref<32x128xf32, #tpu.memory_space<vmem>>, vector<32x128xf32>
    tpu.vector_store %arg12[%c0_43, %c0_44], %90 {strides = array<i32>} : memref<32x128xf32, #tpu.memory_space<vmem>>, vector<32x128xf32>,
    %c1_i32 = arith.constant 1 : i32
    %92 = arith.cmpi eq, %arg0, %c1_i32 : i32
    %93 = arith.extui %92 : i1 to i32
    %c0_i32_45 = arith.constant 0 : i32
    %94 = arith.cmpi ne, %93, %c0_i32_45 : i32
    scf.if %94 {
      %95 = vector.extract_strided_slice %90 {offsets = [0, 0], sizes = [32, 32], strides = [1, 1]} : vector<32x128xf32> to vector<32x32xf32>
      %cst_46 = arith.constant dense<0.000000e+00> : vector<32xf32>
      %96 = vector.multi_reduction <add>, %95, %cst_46 [1] : vector<32x32xf32> to vector<32xf32>
      %97 = vector.shape_cast %96 : vector<32xf32> to vector<32x1xf32>
      %cst_47 = arith.constant 3.200000e+01 : f32
      %98 = vector.broadcast %cst_47 : f32 to vector<32x1xf32>
      %99 = arith.divf %97, %98 : vector<32x1xf32>
      %100 = vector.broadcast %99 : vector<32x1xf32> to vector<32x32xf32>
      %101 = arith.subf %95, %100 : vector<32x32xf32>
      %102 = arith.mulf %101, %101 : vector<32x32xf32>
      %cst_48 = arith.constant dense<0.000000e+00> : vector<32xf32>
      %103 = vector.multi_reduction <add>, %102, %cst_48 [1] : vector<32x32xf32> to vector<32xf32>
      %104 = vector.shape_cast %103 : vector<32xf32> to vector<32x1xf32>
      %cst_49 = arith.constant 3.200000e+01 : f32
      %105 = vector.broadcast %cst_49 : f32 to vector<32x1xf32>
      %106 = arith.divf %104, %105 : vector<32x1xf32>
      %107 = vector.broadcast %99 : vector<32x1xf32> to vector<32x128xf32>
      %108 = arith.subf %90, %107 : vector<32x128xf32>
      %cst_50 = arith.constant 9.99999974E-6 : f32
      %109 = vector.broadcast %cst_50 : f32 to vector<32x1xf32>
      %110 = arith.addf %106, %109 : vector<32x1xf32>
      %111 = math.rsqrt %110 : vector<32x1xf32>
      %112 = vector.broadcast %111 : vector<32x1xf32> to vector<32x128xf32>
      %113 = arith.mulf %108, %112 : vector<32x128xf32>
      %c0_51 = arith.constant 0 : index
      %c0_52 = arith.constant 0 : index
      %114 = vector.load %arg9[%c0_51, %c0_52] : memref<1x128xf32, #tpu.memory_space<vmem>>, vector<1x128xf32>
      %115 = vector.broadcast %114 : vector<1x128xf32> to vector<32x128xf32>
      %116 = arith.mulf %113, %115 : vector<32x128xf32>
      %c0_53 = arith.constant 0 : index
      %c0_54 = arith.constant 0 : index
      %117 = vector.load %arg10[%c0_53, %c0_54] : memref<1x128xf32, #tpu.memory_space<vmem>>, vector<1x128xf32>
      %118 = vector.broadcast %117 : vector<1x128xf32> to vector<32x128xf32>
      %119 = arith.addf %116, %118 : vector<32x128xf32>
      %c0_55 = arith.constant 0 : index
      %c0_56 = arith.constant 0 : index
      %120 = vector.load %arg11[%c0_55, %c0_56] : memref<32x128xf32, #tpu.memory_space<vmem>>, vector<32x128xf32>
      tpu.vector_store %arg11[%c0_55, %c0_56], %119 {strides = array<i32>} : memref<32x128xf32, #tpu.memory_space<vmem>>, vector<32x128xf32>,
    } else {
    }
    return
  }
  func.func @transform_0(%arg0: i32) -> (i32, i32) {
    %c0_i32 = arith.constant 0 : i32
    %c0_i32_0 = arith.constant 0 : i32
    %c0_i32_1 = arith.constant 0 : i32
    return %c0_i32, %c0_i32_0 : i32, i32
  }
  func.func @transform_1(%arg0: i32) -> (i32, i32) {
    %c0_i32 = arith.constant 0 : i32
    %c0_i32_0 = arith.constant 0 : i32
    %c0_i32_1 = arith.constant 0 : i32
    return %c0_i32, %c0_i32_0 : i32, i32
  }
  func.func @transform_2(%arg0: i32) -> (i32, i32) {
    %c0_i32 = arith.constant 0 : i32
    %c0_i32_0 = arith.constant 0 : i32
    %c0_i32_1 = arith.constant 0 : i32
    return %c0_i32, %c0_i32_0 : i32, i32
  }
  func.func @transform_3(%arg0: i32) -> (i32, i32, i32) {
    %c0_i32 = arith.constant 0 : i32
    %c0_i32_0 = arith.constant 0 : i32
    %c0_i32_1 = arith.constant 0 : i32
    return %arg0, %c0_i32, %c0_i32_0 : i32, i32, i32
  }
  func.func @transform_4(%arg0: i32) -> (i32, i32, i32) {
    %c0_i32 = arith.constant 0 : i32
    %c0_i32_0 = arith.constant 0 : i32
    %c0_i32_1 = arith.constant 0 : i32
    return %arg0, %c0_i32, %c0_i32_0 : i32, i32, i32
  }
  func.func @transform_5(%arg0: i32) -> (i32, i32, i32, i32) {
    %c0_i32 = arith.constant 0 : i32
    %c0_i32_0 = arith.constant 0 : i32
    %c0_i32_1 = arith.constant 0 : i32
    %c0_i32_2 = arith.constant 0 : i32
    return %arg0, %c0_i32, %c0_i32_0, %c0_i32_1 : i32, i32, i32, i32
  }
  func.func @transform_6(%arg0: i32) -> (i32, i32, i32, i32) {
    %c0_i32 = arith.constant 0 : i32
    %c0_i32_0 = arith.constant 0 : i32
    %c0_i32_1 = arith.constant 0 : i32
    %c0_i32_2 = arith.constant 0 : i32
    return %arg0, %c0_i32, %c0_i32_0, %c0_i32_1 : i32, i32, i32, i32
  }
  func.func @transform_7(%arg0: i32) -> (i32, i32, i32) {
    %c0_i32 = arith.constant 0 : i32
    %c0_i32_0 = arith.constant 0 : i32
    %c0_i32_1 = arith.constant 0 : i32
    return %arg0, %c0_i32, %c0_i32_0 : i32, i32, i32
  }
  func.func @transform_8(%arg0: i32) -> (i32, i32) {
    %c0_i32 = arith.constant 0 : i32
    %c0_i32_0 = arith.constant 0 : i32
    %c0_i32_1 = arith.constant 0 : i32
    return %c0_i32, %c0_i32_0 : i32, i32
  }
  func.func @transform_9(%arg0: i32) -> (i32, i32) {
    %c0_i32 = arith.constant 0 : i32
    %c0_i32_0 = arith.constant 0 : i32
    %c0_i32_1 = arith.constant 0 : i32
    return %c0_i32, %c0_i32_0 : i32, i32
  }
  func.func @transform_10(%arg0: i32) -> (i32, i32) {
    %c0_i32 = arith.constant 0 : i32
    %c0_i32_0 = arith.constant 0 : i32
    %c0_i32_1 = arith.constant 0 : i32
    return %c0_i32, %c0_i32_0 : i32, i32
  }
}

</mosaic_0001>

<bundles_post_ra>
// kernel: mul.14
= control target key start
LH: loop header
LB: loop body
LE: loop exit
PB: predicated region body
PF: predicated region fallthrough
CT: control target
= control target key end

     0   :  { %s100_s0 = inlined_call_operand.vmem [shape: f32[32,32], index: 0, kind: input, shape index: {}]   ;;  %s101_s1 = inlined_call_operand.vmem [shape: f32[32,32], index: 1, kind: input, shape index: {}]   ;;  %s102_s2 = inlined_call_operand.vmem [shape: f32[32,32], index: 2, kind: output, shape index: {}]  }
   0x1   :  { %v3_v0 = vld [vmem:[%s100_s0] sm:$0xff]  ;;  %v40_v2 = vld [vmem:[%s100_s0 + $0x8] sm:$0xff]  ;;  %v43_v5 = vld [vmem:[%s100_s0 + $0x10] sm:$0xff] }
   0x2   :  { %v4_v1 = vld [vmem:[%s101_s1] sm:$0xff]  ;;  %v41_v4 = vld [vmem:[%s101_s1 + $0x8] sm:$0xff]  ;;  %v44_v6 = vld [vmem:[%s101_s1 + $0x10] sm:$0xff] }
   0x3   :  { %v7_v3 = vmul.f32 %v4_v1, %v3_v0  ;;  %v16_v7 = vmul.f32 %v41_v4, %v40_v2  ;;  %v26_v8 = vmul.f32 %v44_v6, %v43_v5  ;;  %v46_v9 = vld [vmem:[%s100_s0 + $0x18] sm:$0xff] }
   0x4   :  { %v47_v10 = vld [vmem:[%s101_s1 + $0x18] sm:$0xff] }
   0x5   :  { %9 = vst [vmem:[%s102_s2] sm:$0xff] %v7_v3  ;;  %v36_v11 = vmul.f32 %v47_v10, %v46_v9 }
   0x6   :  { %42 = vst [vmem:[%s102_s2 + $0x8] sm:$0xff] %v16_v7 }
   0x7   :  { %45 = vst [vmem:[%s102_s2 + $0x10] sm:$0xff] %v26_v8 }
   0x8   :  { %48 = vst [vmem:[%s102_s2 + $0x18] sm:$0xff] %v36_v11 }

// kernel: vit_forward.1
= control target key start
LH: loop header
LB: loop body
LE: loop exit
PB: predicated region body
PF: predicated region fallthrough
CT: control target
= control target key end

     0   :  { %s2418_s13 = smov 0   ;;  %s3215_s0 = inlined_call_operand.vmem [shape: f32[32,128], index: 0, kind: input, shape index: {}]   ;;  %s3216_s1 = inlined_call_operand.vmem [shape: f32[32,32], index: 1, kind: input, shape index: {}]   ;;  %s3217_s2 = inlined_call_operand.vmem [shape: f32[32,32], index: 2, kind: input, shape index: {}]   ;;  %s3218_s3 = inlined_call_operand.vmem [shape: f32[2,1,32], index: 3, kind: input, shape index: {}]   ;;  %s3219_s4 = inlined_call_operand.vmem [shape: f32[2,1,32], index: 4, kind: input, shape index: {}]   ;;  %s3220_s5 = inlined_call_operand.vmem [shape: f32[2,12,32,8], index: 5, kind: input, shape index: {}]   ;;  %s3221_s6 = inlined_call_operand.vmem [shape: f32[2,4,8,128], index: 6, kind: input, shape index: {}]   ;;  %s3222_s7 = inlined_call_operand.vmem [shape: f32[2,1,128], index: 7, kind: input, shape index: {}]   ;;  %s3223_s8 = inlined_call_operand.vmem [shape: f32[1,128], index: 8, kind: input, shape index: {}]   ;;  %s3224_s9 = inlined_call_operand.vmem [shape: f32[1,128], index: 9, kind: input, shape index: {}]   ;;  %s3225_s10 = inlined_call_operand.vmem [shape: f32[32,128], index: 10, kind: output, shape index: {}]  }
   0x1 LB: > { %s2424_s14 = sadd.s32 4294967295, %s2358_s13   ;;  %p2116_p0 = scmp.ge.s32.totalorder %s2358_s13, 1  ;;  %s2358_s13 = sphi %s2418_s13, %s20_s13  }
   0x2   : > { %p341_p1 = scmp.lt.s32.totalorder %s2358_s13, 3 }
   0x4   : > { %p342_p2 = pnand %p2116_p0, %p341_p1 }
   0x5   : > { %p388_p3 = scmp.lt.s32.totalorder (!%p342_p2), %s2424_s14, 1  ;;  %p2120_p4 = scmp.ne.s32.totalorder (!%p342_p2), %s2424_s14, 0 }
   0x6   : > { %345 = sbr.rel (%p342_p2) target bundleno = 1520 (0x5f0), region = 60 }
   0xb   : > { %s2430_s15 = scalar_select %p388_p3, %s2424_s14, 1 }
   0xc   : > { %410 = sbr.rel (%p2120_p4) target bundleno = 22 (0x16), region = 64 }
   0xd   : > { %s390_s18 = scalar_lea.vmem %s3218_s3, %s2430_s15  ;;  %s393_s21 = scalar_lea.vmem %s3219_s4, %s2430_s15 }
   0xe   : > { %s2237_s22 = smul.u32 384, %s2430_s15  ;;  %s2236_s23 = sshll.u32 %s2430_s15, 5 }
   0xf   : > { %s2445_s26 = scalar_lea.vmem %s3221_s6, %s2236_s23  ;;  %s406_s29 = scalar_lea.vmem %s3222_s7, %s2430_s15 }
  0x10   : > { %s2454_s12 = scalar_lea.vmem %s3220_s5, %s2237_s22 }
  0x11   : > { %v411_v0 = vld [vmem:[%s3215_s0] sm:$0xff]  ;;  %v412_v1 = vld [vmem:[%s3215_s0 + $0x8] sm:$0xff]  ;;  %v413_v2 = vld [vmem:[%s3215_s0 + $0x10] sm:$0xff] }
  0x12   : > { %415 = vst [vmem:[#allocation2 + $0x10] sm:$0xff] %v411_v0  ;;  %v414_v3 = vld [vmem:[%s3215_s0 + $0x18] sm:$0xff] }
  0x13   : > { %416 = vst [vmem:[#allocation2] sm:$0xff] %v412_v1 }
  0x14   : > { %417 = vst [vmem:[#allocation2 + $0x18] sm:$0xff] %v413_v2 }
  0x15   : > { %418 = vst [vmem:[#allocation2 + $0x8] sm:$0xff] %v414_v3 }
  0x16 PF: > { %vm478_vm0 = vcmask 261120   ;;  %v2360_v12 = vmov 32.0   ;;  %v428_v39 = vld [vmem:[%s2454_s12 + $0x18] sm:$0xff]  ;;  %v427_v43 = vld [vmem:[%s2454_s12 + $0x10] sm:$0xff]  ;;  %v426_v47 = vld [vmem:[%s2454_s12 + $0x8] sm:$0xff]  ;;  %vm948_vm14 = vcmask 64512  }
  0x17   : > { %2252 = vrcp.f32 %v2360_v12  ;;  %v432_v40 = vld [vmem:[%s2454_s12 + $0x38] sm:$0xff]  ;;  %612 = vmatpush.msra.mxu0 %v428_v39  ;;  %v431_v44 = vld [vmem:[%s2454_s12 + $0x30] sm:$0xff]  ;;  %v430_v48 = vld [vmem:[%s2454_s12 + $0x28] sm:$0xff]  ;;  %p2233_p5 = scmp.ne.s32.totalorder %s2424_s14, 1 }
  0x18   : > { %v436_v41 = vld [vmem:[%s2454_s12 + $0x58] sm:$0xff]  ;;  %641 = vmatpush.msra.mxu1 %v432_v40  ;;  %v435_v45 = vld [vmem:[%s2454_s12 + $0x50] sm:$0xff]  ;;  %v434_v49 = vld [vmem:[%s2454_s12 + $0x48] sm:$0xff] }
  0x19   : > { %v419_v5 = vld [vmem:[#allocation2 + $0x10] sm:$0xff]  ;;  %v440_v42 = vld [vmem:[%s2454_s12 + $0x78] sm:$0xff]  ;;  %670 = vmatpush.msra.mxu2 %v436_v41  ;;  %613 = vmatpush.msra.mxu0 %v427_v43  ;;  %v438_v50 = vld [vmem:[%s2454_s12 + $0x68] sm:$0xff] }
  0x1a   : > { %v479_v7 = vsel %vm478_vm0, %v419_v5, 0.0  ;;  %v420_v9 = vld [vmem:[#allocation2] sm:$0xff]  ;;  %699 = vmatpush.msra.mxu3 %v440_v42  ;;  %642 = vmatpush.msra.mxu1 %v431_v44  ;;  %v439_v46 = vld [vmem:[%s2454_s12 + $0x70] sm:$0xff]  ;;  %v446_v39 = vld [vmem:[%s2454_s12 + $0xa8] sm:$0xff] }
  0x1b   : > { %v421_v4 = vld [vmem:[#allocation2 + $0x18] sm:$0xff]  ;;  %480 = vadd.xlane.f32.xlu0 %v479_v7  ;;  %v482_v11 = vsel %vm478_vm0, %v420_v9, 0.0  ;;  %671 = vmatpush.msra.mxu2 %v435_v45  ;;  %v425_v51 = vld [vmem:[%s2454_s12] sm:$0xff]  ;;  %v450_v40 = vld [vmem:[%s2454_s12 + $0xc8] sm:$0xff] }
  0x1c   : > { %v485_v6 = vsel %vm478_vm0, %v421_v4, 0.0  ;;  %v422_v8 = vld [vmem:[#allocation2 + $0x8] sm:$0xff]  ;;  %700 = vmatpush.msra.mxu3 %v439_v46  ;;  %614 = vmatpush.msra.mxu0 %v426_v47  ;;  %v429_v52 = vld [vmem:[%s2454_s12 + $0x20] sm:$0xff] }
  0x1d   : > { %486 = vadd.xlane.f32.xlu1 %v485_v6  ;;  %v488_v10 = vsel %vm478_vm0, %v422_v8, 0.0  ;;  %v2253_v13 = vpop.eup %2252  ;;  %643 = vmatpush.msra.mxu1 %v430_v48  ;;  %v433_v53 = vld [vmem:[%s2454_s12 + $0x40] sm:$0xff]  ;;  %v454_v41 = vld [vmem:[%s2454_s12 + $0xe8] sm:$0xff] }
  0x1e   : > { %v492_v14 = vmul.f32 32.0, %v2253_v13  ;;  %vm496_vm1 = vweird.f32 %v2253_v13  ;;  %672 = vmatpush.msra.mxu2 %v434_v49  ;;  %701 = vmatpush.msra.mxu3 %v438_v50  ;;  %v437_v54 = vld [vmem:[%s2454_s12 + $0x60] sm:$0xff] }
  0x1f   : > { %615 = vmatpush.msra.mxu0 %v425_v51  ;;  %644 = vmatpush.msra.mxu1 %v429_v52  ;;  %v441_v44 = vld [vmem:[%s2454_s12 + $0x80] sm:$0xff] }
  0x20   : > { %v493_v15 = vsub.f32 1.0, %v492_v14  ;;  %673 = vmatpush.msra.mxu2 %v433_v53  ;;  %702 = vmatpush.msra.mxu3 %v437_v54  ;;  %v445_v45 = vld [vmem:[%s2454_s12 + $0xa0] sm:$0xff] }
  0x21   : > { %v449_v50 = vld [vmem:[%s2454_s12 + $0xc0] sm:$0xff] }
  0x22   : > { %v494_v16 = vmul.f32 %v2253_v13, %v493_v15  ;;  %v453_v51 = vld [vmem:[%s2454_s12 + $0xe0] sm:$0xff] }
  0x23   : > { %483 = vadd.xlane.f32.xlu0 %v482_v11 }
  0x24   : > { %v495_v17 = vadd.f32 %v2253_v13, %v494_v16  ;;  %v2542_v16 = vld [vmem:[%s390_s18] ss:$0 sm:$0xff] }
  0x25   : > { %489 = vadd.xlane.f32.xlu1 %v488_v10 }
  0x26   : > { %v2473_v18 = vsel %vm496_vm1, %v2253_v13, %v495_v17 }
  0x8e   : > { %v481_v20 = vpop.xlane.xlu0 %480 }
  0x8f   : > { %v498_v22 = vmul.f32 %v2473_v18, %v481_v20 }
  0x90   : > { %v487_v19 = vpop.xlane.xlu1 %486 }
  0x91   : > { %v500_v21 = vmul.f32 %v2473_v18, %v487_v19  ;;  %v2479_v24 = vsub.f32 %v419_v5, %v498_v22 }
  0x93   : > { %v2477_v23 = vsub.f32 %v421_v4, %v500_v21  ;;  %v506_v26 = vmul.f32 %v2479_v24, %v2479_v24  ;;  %v2552_v21 = vld [vmem:[%s393_s21] ss:$0 sm:$0xff] }
  0x95   : > { %v508_v25 = vmul.f32 %v2477_v23, %v2477_v23  ;;  %v510_v28 = vsel %vm478_vm0, %v506_v26, 0.0 }
  0x96   : > { %511 = vadd.xlane.f32.xlu2 %v510_v28  ;;  %v484_v30 = vpop.xlane.xlu0 %483  ;;  %v448_v28 = vld [vmem:[%s2454_s12 + $0xb8] sm:$0xff] }
  0x97   : > { %v516_v27 = vsel %vm478_vm0, %v508_v25, 0.0  ;;  %v499_v32 = vmul.f32 %v2473_v18, %v484_v30  ;;  %757 = vmatpush.msrb.mxu1 %v448_v28  ;;  %v443_v30 = vld [vmem:[%s2454_s12 + $0x90] sm:$0xff] }
  0x98   : > { %v490_v29 = vpop.xlane.xlu1 %489  ;;  %517 = vadd.xlane.f32.xlu0 %v516_v27  ;;  %v444_v27 = vld [vmem:[%s2454_s12 + $0x98] sm:$0xff] }
  0x99   : > { %v501_v31 = vmul.f32 %v2473_v18, %v490_v29  ;;  %v2491_v34 = vsub.f32 %v420_v9, %v499_v32  ;;  %v456_v9 = vld [vmem:[%s2454_s12 + $0xf8] sm:$0xff]  ;;  %v451_v29 = vld [vmem:[%s2454_s12 + $0xd0] sm:$0xff]  ;;  %728 = vmatpush.msrb.mxu0 %v444_v27 }
  0x9a   : > { %815 = vmatpush.msrb.mxu3 %v456_v9  ;;  %v455_v32 = vld [vmem:[%s2454_s12 + $0xf0] sm:$0xff]  ;;  %v466_v9 = vld [vmem:[%s2454_s12 + $0x148] sm:$0xff] }
  0x9b   : > { %v2489_v33 = vsub.f32 %v422_v8, %v501_v31  ;;  %v507_v36 = vmul.f32 %v2491_v34, %v2491_v34  ;;  %v452_v8 = vld [vmem:[%s2454_s12 + $0xd8] sm:$0xff]  ;;  %v447_v31 = vld [vmem:[%s2454_s12 + $0xb0] sm:$0xff]  ;;  %729 = vmatpush.msrb.mxu0 %v443_v30 }
  0x9c   : > { %786 = vmatpush.msrb.mxu2 %v452_v8  ;;  %816 = vmatpush.msrb.mxu3 %v455_v32  ;;  %v462_v8 = vld [vmem:[%s2454_s12 + $0x128] sm:$0xff] }
  0x9d   : > { %v509_v35 = vmul.f32 %v2489_v33, %v2489_v33  ;;  %v513_v38 = vsel %vm478_vm0, %v507_v36, 0.0  ;;  %758 = vmatpush.msrb.mxu1 %v447_v31 }
  0x9e   : > { %514 = vadd.xlane.f32.xlu2 %v513_v38  ;;  %787 = vmatpush.msrb.mxu2 %v451_v29 }
  0x9f   : > { %v519_v37 = vsel %vm478_vm0, %v509_v35, 0.0  ;;  %817 = vmatpush.msrb.mxu3 %v454_v41  ;;  %759 = vmatpush.msrb.mxu1 %v446_v39 }
  0xa0   : > { %520 = vadd.xlane.f32.xlu1 %v519_v37  ;;  %788 = vmatpush.msrb.mxu2 %v450_v40 }
  0xa1   : > { %760 = vmatpush.msrb.mxu1 %v445_v45  ;;  %818 = vmatpush.msrb.mxu3 %v453_v51 }
  0xa2   : > { %789 = vmatpush.msrb.mxu2 %v449_v50 }
 0x109   : > { %v512_v55 = vpop.xlane.xlu2 %511 }
 0x10a   : > { %v522_v57 = vmul.f32 %v512_v55, %v2473_v18 }
 0x10b   : > { %v518_v56 = vpop.xlane.xlu0 %517 }
 0x10c   : > { %v524_v58 = vmul.f32 %v518_v56, %v2473_v18  ;;  %v526_v59 = vadd.f32 1e-05, %v522_v57 }
 0x10e   : > { %v2517_v60 = vadd.f32 1e-05, %v524_v58  ;;  %2254 = vrsqrt.f32 %v526_v59  ;;  %vm536_vm3 = vweird.f32 %v526_v59 }
 0x110   : > { %2256 = vrsqrt.f32 %v2517_v60  ;;  %vm556_vm5 = vweird.f32 %v2517_v60 }
 0x111   : > { %v515_v62 = vpop.xlane.xlu2 %514 }
 0x112   : > { %v523_v0 = vmul.f32 %v515_v62, %v2473_v18 }
 0x113   : > { %v521_v61 = vpop.xlane.xlu1 %520 }
 0x114   : > { %v525_v63 = vmul.f32 %v521_v61, %v2473_v18  ;;  %v2255_v1 = vpop.eup %2254  ;;  %v2524_v3 = vadd.f32 1e-05, %v523_v0  ;;  %v464_v0 = vld [vmem:[%s2454_s12 + $0x138] sm:$0xff] }
 0x115   : > { %v531_v5 = vmul.f32 %v2255_v1, %v526_v59  ;;  %vm537_vm2 = vweird.f32 %v2255_v1 }
 0x116   : > { %v2522_v2 = vadd.f32 1e-05, %v525_v63  ;;  %v2526_v4 = vpop.eup %2256  ;;  %vm538_vm4 = vmor %vm536_vm3, %vm537_vm2  ;;  %vm546_vm9 = vweird.f32 %v2524_v3  ;;  %v460_v63 = vld [vmem:[%s2454_s12 + $0x118] sm:$0xff] }
 0x117   : > { %v551_v6 = vmul.f32 %v2526_v4, %v2517_v60  ;;  %v532_v7 = vmul.f32 %v2255_v1, %v531_v5  ;;  %vm557_vm6 = vweird.f32 %v2526_v4  ;;  %v467_v5 = vld [vmem:[%s2454_s12 + $0x150] sm:$0xff] }
 0x118   : > { %2258 = vrsqrt.f32 %v2522_v2  ;;  %vm2577_vm8 = vmor %vm556_vm5, %vm557_vm6  ;;  %vm566_vm11 = vweird.f32 %v2522_v2 }
 0x119   : > { %2260 = vrsqrt.f32 %v2524_v3  ;;  %v533_v10 = vmul.f32 0.5, %v532_v7  ;;  %v552_v11 = vmul.f32 %v2526_v4, %v551_v6  ;;  %v471_v6 = vld [vmem:[%s2454_s12 + $0x170] sm:$0xff]  ;;  %v458_v7 = vld [vmem:[%s2454_s12 + $0x108] sm:$0xff] }
 0x11b   : > { %v534_v12 = vsub.f32 1.5, %v533_v10  ;;  %v553_v17 = vmul.f32 0.5, %v552_v11  ;;  %v470_v10 = vld [vmem:[%s2454_s12 + $0x168] sm:$0xff]  ;;  %v457_v11 = vld [vmem:[%s2454_s12 + $0x100] sm:$0xff] }
 0x11d   : > { %v535_v15 = vmul.f32 %v2255_v1, %v534_v12  ;;  %v554_v36 = vsub.f32 1.5, %v553_v17  ;;  %v461_v12 = vld [vmem:[%s2454_s12 + $0x120] sm:$0xff] }
 0x11e   : > { %v2535_v13 = vpop.eup %2258 }
 0x11f   : > { %v2261_v14 = vpop.eup %2260  ;;  %v561_v19 = vmul.f32 %v2535_v13, %v2522_v2  ;;  %v539_v22 = vsel %vm538_vm4, %v2255_v1, %v535_v15  ;;  %v555_v46 = vmul.f32 %v2526_v4, %v554_v36  ;;  %vm567_vm12 = vweird.f32 %v2535_v13  ;;  %v468_v1 = vld [vmem:[%s2454_s12 + $0x158] sm:$0xff] }
 0x120   : > { %v541_v20 = vmul.f32 %v2261_v14, %v2524_v3  ;;  %v570_v25 = vmul.f32 %v539_v22, %v2479_v24  ;;  %v442_v24 = vld [vmem:[%s2454_s12 + $0x88] sm:$0xff]  ;;  %vm547_vm7 = vweird.f32 %v2261_v14  ;;  %vm568_vm13 = vmor %vm566_vm11, %vm567_vm12  ;;  %v472_v2 = vld [vmem:[%s2454_s12 + $0x178] sm:$0xff] }
 0x121   : > { %v562_v37 = vmul.f32 %v2535_v13, %v561_v19  ;;  %730 = vmatpush.msrb.mxu0 %v442_v24  ;;  %vm548_vm10 = vmor %vm546_vm9, %vm547_vm7  ;;  %v559_v54 = vsel %vm2577_vm8, %v2526_v4, %v555_v46  ;;  %v459_v3 = vld [vmem:[%s2454_s12 + $0x110] sm:$0xff] }
 0x122   : > { %v542_v26 = vmul.f32 %v2261_v14, %v541_v20  ;;  %v577_v35 = vmul.f32 %v2542_v16, %v570_v25  ;;  %v572_v57 = vmul.f32 %v559_v54, %v2477_v23  ;;  %v463_v4 = vld [vmem:[%s2454_s12 + $0x130] sm:$0xff] }
 0x123   : > { %v563_v48 = vmul.f32 0.5, %v562_v37  ;;  %731 = vmatpush.msrb.mxu0 %v441_v44 }
 0x124   : > { %v543_v38 = vmul.f32 0.5, %v542_v26  ;;  %v2570_v42 = vadd.f32 %v2552_v21, %v577_v35  ;;  %v579_v23 = vmul.f32 %v2542_v16, %v572_v57 }
 0x125   : > { %v564_v55 = vsub.f32 1.5, %v563_v48 }
 0x126   : > { %v544_v43 = vsub.f32 1.5, %v543_v38  ;;  %2121 = vmatmul.msk.f32.vlgmr.msra.gmra.mxu0 %vm478_vm0, %v2570_v42  ;;  %2125 = vmatmul.msk.f32.vlgmr.msra.gmra.mxu1 %vm478_vm0, %v2570_v42  ;;  %v2616_v60 = vadd.f32 %v2552_v21, %v579_v23 }
 0x127   : > { %2129 = vmatmul.msk.f32.vlgmr.msra.gmra.mxu2 %vm478_vm0, %v2570_v42  ;;  %2133 = vmatmul.msk.f32.vlgmr.msra.gmra.mxu3 %vm478_vm0, %v2570_v42 }
 0x128   : > { %v545_v49 = vmul.f32 %v2261_v14, %v544_v43  ;;  %844 = vmatpush.msra.mxu0 %v460_v63  ;;  %873 = vmatpush.msra.mxu1 %v464_v0  ;;  %v2361_v0 = vmov 4.0  }
 0x129   : > { %902 = vmatpush.msra.mxu2 %v468_v1  ;;  %931 = vmatpush.msra.mxu3 %v472_v2  ;;  %2262 = vrcp.f32 %v2361_v0 }
 0x12a   : > { %v549_v52 = vsel %vm548_vm10, %v2261_v14, %v545_v49  ;;  %845 = vmatpush.msra.mxu0 %v459_v3  ;;  %874 = vmatpush.msra.mxu1 %v463_v4  ;;  %v469_v14 = vld [vmem:[%s2454_s12 + $0x160] sm:$0xff] }
 0x12b   : > { %v571_v53 = vmul.f32 %v549_v52, %v2491_v34  ;;  %v565_v34 = vmul.f32 %v2535_v13, %v564_v55  ;;  %903 = vmatpush.msra.mxu2 %v467_v5  ;;  %932 = vmatpush.msra.mxu3 %v471_v6  ;;  %v1177_v4 = vld [vmem:[%s3216_s1] sm:$0xff]  ;;  %v2362_v6 = vmov 3.0  }
 0x12c   : > { %846 = vmatpush.msra.mxu0 %v458_v7  ;;  %875 = vmatpush.msra.mxu1 %v462_v8  ;;  %2264 = vrcp.f32 %v2362_v6  ;;  %v1181_v8 = vadd.f32 1.0, %v1177_v4 }
 0x12d   : > { %v578_v56 = vmul.f32 %v2542_v16, %v571_v53  ;;  %v569_v59 = vsel %vm568_vm13, %v2535_v13, %v565_v34  ;;  %904 = vmatpush.msra.mxu2 %v466_v9  ;;  %933 = vmatpush.msra.mxu3 %v470_v10  ;;  %v465_v13 = vld [vmem:[%s2454_s12 + $0x140] sm:$0xff] }
 0x12e   : > { %v573_v61 = vmul.f32 %v569_v59, %v2489_v33  ;;  %847 = vmatpush.msra.mxu0 %v457_v11  ;;  %876 = vmatpush.msra.mxu1 %v461_v12 }
 0x12f   : > { %v2602_v58 = vadd.f32 %v2552_v21, %v578_v56  ;;  %905 = vmatpush.msra.mxu2 %v465_v13  ;;  %934 = vmatpush.msra.mxu3 %v469_v14  ;;  %v2263_v1 = vpop.eup %2262 }
 0x130   : > { %v580_v62 = vmul.f32 %v2542_v16, %v573_v61  ;;  %v1230_v5 = vmul.f32 4.0, %v2263_v1  ;;  %vm1234_vm15 = vweird.f32 %v2263_v1 }
 0x131   : > { %2122 = vmatmul.msk.f32.gmra.mxu0 %vm478_vm0, %v2602_v58  ;;  %2126 = vmatmul.msk.f32.gmra.mxu1 %vm478_vm0, %v2602_v58 }
 0x132   : > { %2130 = vmatmul.msk.f32.gmra.mxu2 %vm478_vm0, %v2602_v58  ;;  %2134 = vmatmul.msk.f32.gmra.mxu3 %vm478_vm0, %v2602_v58  ;;  %v2629_v33 = vadd.f32 %v2552_v21, %v580_v62  ;;  %v1231_v10 = vsub.f32 1.0, %v1230_v5  ;;  %v2778_v13 = vpop.eup %2264 }
 0x133   : > { %vm1305_vm1 = vweird.f32 %v2778_v13 }
 0x139   : > { %2123 = vmatmul.msk.f32.gmra.mxu0 %vm478_vm0, %v2616_v60  ;;  %2127 = vmatmul.msk.f32.gmra.mxu1 %vm478_vm0, %v2616_v60 }
 0x13a   : > { %2131 = vmatmul.msk.f32.gmra.mxu2 %vm478_vm0, %v2616_v60  ;;  %2135 = vmatmul.msk.f32.gmra.mxu3 %vm478_vm0, %v2616_v60 }
 0x141   : > { %2124 = vmatmul.msk.f32.gmra.mxu0 %vm478_vm0, %v2629_v33  ;;  %2128 = vmatmul.msk.f32.gmra.mxu1 %vm478_vm0, %v2629_v33 }
 0x142   : > { %2132 = vmatmul.msk.f32.gmra.mxu2 %vm478_vm0, %v2629_v33  ;;  %2136 = vmatmul.msk.f32.gmra.mxu3 %vm478_vm0, %v2629_v33 }
 0x149   : > { %2137 = vmatmul.msk.f32.vlgmr.msrb.gmra.mxu0 %vm478_vm0, %v2570_v42  ;;  %2141 = vmatmul.msk.f32.vlgmr.msrb.gmra.mxu1 %vm478_vm0, %v2570_v42 }
 0x14a   : > { %2145 = vmatmul.msk.f32.vlgmr.msrb.gmra.mxu2 %vm478_vm0, %v2570_v42  ;;  %2149 = vmatmul.msk.f32.vlgmr.msrb.gmra.mxu3 %vm478_vm0, %v2570_v42 }
 0x151   : > { %2138 = vmatmul.msk.f32.gmra.mxu0 %vm478_vm0, %v2602_v58  ;;  %2142 = vmatmul.msk.f32.gmra.mxu1 %vm478_vm0, %v2602_v58 }
 0x152   : > { %2146 = vmatmul.msk.f32.gmra.mxu2 %vm478_vm0, %v2602_v58  ;;  %2150 = vmatmul.msk.f32.gmra.mxu3 %vm478_vm0, %v2602_v58 }
 0x159   : > { %2139 = vmatmul.msk.f32.gmra.mxu0 %vm478_vm0, %v2616_v60  ;;  %2143 = vmatmul.msk.f32.gmra.mxu1 %vm478_vm0, %v2616_v60 }
 0x15a   : > { %2147 = vmatmul.msk.f32.gmra.mxu2 %vm478_vm0, %v2616_v60  ;;  %2151 = vmatmul.msk.f32.gmra.mxu3 %vm478_vm0, %v2616_v60 }
 0x161   : > { %2140 = vmatmul.msk.f32.gmra.mxu0 %vm478_vm0, %v2629_v33  ;;  %2144 = vmatmul.msk.f32.gmra.mxu1 %vm478_vm0, %v2629_v33 }
 0x162   : > { %2148 = vmatmul.msk.f32.gmra.mxu2 %vm478_vm0, %v2629_v33  ;;  %2152 = vmatmul.msk.f32.gmra.mxu3 %vm478_vm0, %v2629_v33 }
 0x169   : > { %2153 = vmatmul.msk.f32.vlgmr.msra.gmra.mxu0 %vm478_vm0, %v2570_v42  ;;  %2157 = vmatmul.msk.f32.vlgmr.msra.gmra.mxu1 %vm478_vm0, %v2570_v42 }
 0x16a   : > { %2161 = vmatmul.msk.f32.vlgmr.msra.gmra.mxu2 %vm478_vm0, %v2570_v42  ;;  %2165 = vmatmul.msk.f32.vlgmr.msra.gmra.mxu3 %vm478_vm0, %v2570_v42 }
 0x171   : > { %2154 = vmatmul.msk.f32.gmra.mxu0 %vm478_vm0, %v2602_v58  ;;  %2158 = vmatmul.msk.f32.gmra.mxu1 %vm478_vm0, %v2602_v58 }
 0x172   : > { %2162 = vmatmul.msk.f32.gmra.mxu2 %vm478_vm0, %v2602_v58  ;;  %2166 = vmatmul.msk.f32.gmra.mxu3 %vm478_vm0, %v2602_v58 }
 0x179   : > { %2155 = vmatmul.msk.f32.gmra.mxu0 %vm478_vm0, %v2616_v60  ;;  %2159 = vmatmul.msk.f32.gmra.mxu1 %vm478_vm0, %v2616_v60 }
 0x17a   : > { %2163 = vmatmul.msk.f32.gmra.mxu2 %vm478_vm0, %v2616_v60  ;;  %2167 = vmatmul.msk.f32.gmra.mxu3 %vm478_vm0, %v2616_v60 }
 0x181   : > { %2156 = vmatmul.msk.f32.gmra.mxu0 %vm478_vm0, %v2629_v33  ;;  %2160 = vmatmul.msk.f32.gmra.mxu1 %vm478_vm0, %v2629_v33 }
 0x182   : > { %2164 = vmatmul.msk.f32.gmra.mxu2 %vm478_vm0, %v2629_v33  ;;  %2168 = vmatmul.msk.f32.gmra.mxu3 %vm478_vm0, %v2629_v33 }
 0x1a3   : > { %v617_v15 = vpop.f32.mrf.mxu0  ;;  %v646_v16 = vpop.f32.mrf.mxu1 }
 0x1aa   : > { %v675_v17 = vpop.f32.mrf.mxu2  ;;  %v704_v19 = vpop.f32.mrf.mxu3 }
 0x1ae   : > { %v620_v20 = vpop.f32.mrf.mxu0  ;;  %v649_v21 = vpop.f32.mrf.mxu1 }
 0x1b5   : > { %v678_v22 = vpop.f32.mrf.mxu2  ;;  %v707_v25 = vpop.f32.mrf.mxu3 }
 0x1b6   : > { %v2719_v26 = vpop.f32.mrf.mxu0  ;;  %v2721_v27 = vpop.f32.mrf.mxu1 }
 0x1bd   : > { %v2723_v28 = vpop.f32.mrf.mxu2  ;;  %v2725_v29 = vpop.f32.mrf.mxu3 }
 0x1be   : > { %v2727_v30 = vpop.f32.mrf.mxu0  ;;  %v2729_v31 = vpop.f32.mrf.mxu1 }
 0x1c5   : > { %v2731_v32 = vpop.f32.mrf.mxu2  ;;  %v2733_v35 = vpop.f32.mrf.mxu3 }
 0x1c6   : > { %v733_v36 = vpop.f32.mrf.mxu0  ;;  %v762_v37 = vpop.f32.mrf.mxu1 }
 0x1cd   : > { %v791_v38 = vpop.f32.mrf.mxu2  ;;  %v820_v24 = vpop.f32.mrf.mxu3 }
 0x1ce   : > { %v736_v39 = vpop.f32.mrf.mxu0  ;;  %v765_v40 = vpop.f32.mrf.mxu1 }
 0x1d5   : > { %v794_v41 = vpop.f32.mrf.mxu2  ;;  %v823_v42 = vpop.f32.mrf.mxu3 }
 0x1d6   : > { %v739_v43 = vpop.f32.mrf.mxu0  ;;  %v768_v44 = vpop.f32.mrf.mxu1 }
 0x1dd   : > { %v797_v45 = vpop.f32.mrf.mxu2  ;;  %v826_v46 = vpop.f32.mrf.mxu3 }
 0x1de   : > { %v742_v47 = vpop.f32.mrf.mxu0  ;;  %v771_v48 = vpop.f32.mrf.mxu1 }
 0x1df   : > { %2169 = vmatpush.xpose.msk.msrb.mxu0 %vm948_vm14, %v742_v47  ;;  %2177 = vmatpush.xpose.msk.msrb.mxu1 %vm948_vm14, %v771_v48 }
 0x1e3   : > { %2170 = vmatpush.xpose.msk.msrb.mxu0 %vm948_vm14, %v739_v43  ;;  %2178 = vmatpush.xpose.msk.msrb.mxu1 %vm948_vm14, %v768_v44 }
 0x1e5   : > { %v800_v49 = vpop.f32.mrf.mxu2  ;;  %v829_v50 = vpop.f32.mrf.mxu3 }
 0x1e6   : > { %2185 = vmatpush.xpose.msk.msrb.mxu2 %vm948_vm14, %v800_v49  ;;  %2193 = vmatpush.xpose.msk.msrb.mxu3 %vm948_vm14, %v829_v50  ;;  %v849_v51 = vpop.f32.mrf.mxu0  ;;  %v878_v52 = vpop.f32.mrf.mxu1 }
 0x1e7   : > { %2171 = vmatpush.xpose.msk.msrb.mxu0 %vm948_vm14, %v736_v39  ;;  %2179 = vmatpush.xpose.msk.msrb.mxu1 %vm948_vm14, %v765_v40 }
 0x1ea   : > { %2186 = vmatpush.xpose.msk.msrb.mxu2 %vm948_vm14, %v797_v45  ;;  %2194 = vmatpush.xpose.msk.msrb.mxu3 %vm948_vm14, %v826_v46 }
 0x1eb   : > { %2172 = vmatpush.xpose.msk.msrb.mxu0 %vm948_vm14, %v733_v36  ;;  %2180 = vmatpush.xpose.msk.msrb.mxu1 %vm948_vm14, %v762_v37  ;;  %v1179_v36 = vld [vmem:[%s3216_s1 + $0x10] sm:$0xff] }
 0x1ec   : > { %v1183_v44 = vadd.f32 1.0, %v1179_v36 }
 0x1ed   : > { %v907_v53 = vpop.f32.mrf.mxu2  ;;  %v936_v54 = vpop.f32.mrf.mxu3 }
 0x1ee   : > { %2187 = vmatpush.xpose.msk.msrb.mxu2 %vm948_vm14, %v794_v41  ;;  %2195 = vmatpush.xpose.msk.msrb.mxu3 %vm948_vm14, %v823_v42  ;;  %v852_v55 = vpop.f32.mrf.mxu0  ;;  %v881_v56 = vpop.f32.mrf.mxu1 }
 0x1ef   : > { %2173 = vmatmul.msk.f32.vlgmr.msrb.gmra.mxu0 %vm948_vm14, %v617_v15  ;;  %2181 = vmatmul.msk.f32.vlgmr.msrb.gmra.mxu1 %vm948_vm14, %v646_v16  ;;  %v1178_v16 = vld [vmem:[%s3216_s1 + $0x8] sm:$0xff] }
 0x1f2   : > { %2188 = vmatpush.xpose.msk.msrb.mxu2 %vm948_vm14, %v791_v38  ;;  %2196 = vmatpush.xpose.msk.msrb.mxu3 %vm948_vm14, %v820_v24 }
 0x1f5   : > { %v910_v57 = vpop.f32.mrf.mxu2  ;;  %v939_v58 = vpop.f32.mrf.mxu3  ;;  %2189 = vmatmul.msk.f32.vlgmr.msrb.gmra.mxu2 %vm948_vm14, %v675_v17  ;;  %2197 = vmatmul.msk.f32.vlgmr.msrb.gmra.mxu3 %vm948_vm14, %v704_v19  ;;  %v1232_v17 = vmul.f32 %v2263_v1, %v1231_v10 }
 0x1f6   : > { %v855_v34 = vpop.f32.mrf.mxu0  ;;  %v884_v23 = vpop.f32.mrf.mxu1 }
 0x1f7   : > { %2174 = vmatmul.msk.f32.gmra.mxu0 %vm948_vm14, %v620_v20  ;;  %2182 = vmatmul.msk.f32.gmra.mxu1 %vm948_vm14, %v649_v21  ;;  %v1301_v21 = vmul.f32 3.0, %v2778_v13 }
 0x1f9   : > { %v1302_v40 = vsub.f32 1.0, %v1301_v21 }
 0x1fd   : > { %v913_v59 = vpop.f32.mrf.mxu2  ;;  %v942_v60 = vpop.f32.mrf.mxu3  ;;  %2190 = vmatmul.msk.f32.gmra.mxu2 %vm948_vm14, %v678_v22  ;;  %2198 = vmatmul.msk.f32.gmra.mxu3 %vm948_vm14, %v707_v25 }
 0x1fe   : > { %v858_v61 = vpop.f32.mrf.mxu0  ;;  %v887_v62 = vpop.f32.mrf.mxu1 }
 0x1ff   : > { %2175 = vmatmul.msk.f32.gmra.mxu0 %vm948_vm14, %v2719_v26  ;;  %2183 = vmatmul.msk.f32.gmra.mxu1 %vm948_vm14, %v2721_v27 }
 0x200   : > { %1603 = vmatpush.msra.mxu0 %v858_v61  ;;  %1644 = vmatpush.msra.mxu1 %v887_v62 }
 0x202   : > { %1604 = vmatpush.msra.mxu0 %v855_v34  ;;  %1645 = vmatpush.msra.mxu1 %v884_v23 }
 0x204   : > { %1605 = vmatpush.msra.mxu0 %v852_v55  ;;  %1646 = vmatpush.msra.mxu1 %v881_v56 }
 0x205   : > { %v916_v33 = vpop.f32.mrf.mxu2  ;;  %v945_v63 = vpop.f32.mrf.mxu3  ;;  %2191 = vmatmul.msk.f32.gmra.mxu2 %vm948_vm14, %v2723_v28  ;;  %2199 = vmatmul.msk.f32.gmra.mxu3 %vm948_vm14, %v2725_v29  ;;  %v1182_v29 = vadd.f32 1.0, %v1178_v16 }
 0x206   : > { %1606 = vmatpush.msra.mxu0 %v849_v51  ;;  %1647 = vmatpush.msra.mxu1 %v878_v52  ;;  %v1303_v52 = vmul.f32 %v2778_v13, %v1302_v40 }
 0x207   : > { %1685 = vmatpush.msra.mxu2 %v916_v33  ;;  %1726 = vmatpush.msra.mxu3 %v945_v63 }
 0x208   : > { %2176 = vmatmul.msk.f32.gmra.mxu0 %vm948_vm14, %v2727_v30  ;;  %2184 = vmatmul.msk.f32.gmra.mxu1 %vm948_vm14, %v2729_v31 }
 0x209   : > { %1686 = vmatpush.msra.mxu2 %v913_v59  ;;  %1727 = vmatpush.msra.mxu3 %v942_v60 }
 0x20b   : > { %1687 = vmatpush.msra.mxu2 %v910_v57  ;;  %1728 = vmatpush.msra.mxu3 %v939_v58  ;;  %v1180_v58 = vld [vmem:[%s3216_s1 + $0x18] sm:$0xff] }
 0x20c   : > { %v1184_v4 = vadd.f32 1.0, %v1180_v58 }
 0x20d   : > { %1688 = vmatpush.msra.mxu2 %v907_v53  ;;  %1729 = vmatpush.msra.mxu3 %v936_v54 }
 0x20e   : > { %2192 = vmatmul.msk.f32.gmra.mxu2 %vm948_vm14, %v2731_v32  ;;  %2200 = vmatmul.msk.f32.gmra.mxu3 %vm948_vm14, %v2733_v35  ;;  %v1233_v35 = vadd.f32 %v2263_v1, %v1232_v17 }
 0x210   : > { %v2791_v46 = vsel %vm1234_vm15, %v2263_v1, %v1233_v35  ;;  %v1304_v1 = vadd.f32 %v2778_v13, %v1303_v52 }
 0x26c   : > { %v990_v2 = vpop.f32.mrf.mxu0  ;;  %v1043_v3 = vpop.f32.mrf.mxu1 }
 0x26d   : > { %v1161_v7 = vmul.f32 0.35355338, %v990_v2  ;;  %v1165_v9 = vmul.f32 0.35355338, %v1043_v3 }
 0x26f   : > { %v1185_v14 = vmul.f32 %v1181_v8, %v1161_v7  ;;  %v1189_v15 = vmul.f32 %v1181_v8, %v1165_v9 }
 0x271   : > { %v1201_v22 = vsel %vm478_vm0, %v1185_v14, 0.0  ;;  %v1202_v25 = vsel %vm478_vm0, %v1189_v15, 0.0 }
 0x272   : > { %v1203_v37 = vadd.f32 %v1202_v25, %v1201_v22 }
 0x274   : > { %v993_v11 = vpop.f32.mrf.mxu0  ;;  %v1046_v12 = vpop.f32.mrf.mxu1 }
 0x275   : > { %v1162_v28 = vmul.f32 0.35355338, %v993_v11  ;;  %v1166_v30 = vmul.f32 0.35355338, %v1046_v12 }
 0x277   : > { %v1186_v41 = vmul.f32 %v1182_v29, %v1162_v28  ;;  %v1190_v42 = vmul.f32 %v1182_v29, %v1166_v30  ;;  %v2834_v30 = vsel %vm1305_vm1, %v2778_v13, %v1304_v1 }
 0x278   : > { %v1096_v19 = vpop.f32.mrf.mxu2  ;;  %v1149_v20 = vpop.f32.mrf.mxu3 }
 0x279   : > { %v1169_v26 = vmul.f32 0.35355338, %v1096_v19  ;;  %v1173_v27 = vmul.f32 0.35355338, %v1149_v20  ;;  %v1208_v55 = vsel %vm478_vm0, %v1186_v41, 0.0  ;;  %v1209_v56 = vsel %vm478_vm0, %v1190_v42, 0.0 }
 0x27a   : > { %v1210_v0 = vadd.f32 %v1209_v56, %v1208_v55 }
 0x27b   : > { %v1193_v31 = vmul.f32 %v1181_v8, %v1169_v26  ;;  %v1197_v32 = vmul.f32 %v1181_v8, %v1173_v27 }
 0x27c   : > { %v996_v38 = vpop.f32.mrf.mxu0  ;;  %v1049_v24 = vpop.f32.mrf.mxu1 }
 0x27d   : > { %v1204_v39 = vsel %vm478_vm0, %v1193_v31, 0.0  ;;  %v1206_v45 = vsel %vm478_vm0, %v1197_v32, 0.0  ;;  %v1163_v47 = vmul.f32 0.35355338, %v996_v38  ;;  %v1167_v48 = vmul.f32 0.35355338, %v1049_v24 }
 0x27e   : > { %v1205_v43 = vadd.f32 %v1204_v39, %v1203_v37 }
 0x27f   : > { %v2800_v34 = vmul.f32 %v1183_v44, %v1163_v47  ;;  %v2802_v23 = vmul.f32 %v1183_v44, %v1167_v48 }
 0x280   : > { %v1207_v49 = vadd.f32 %v1206_v45, %v1205_v43  ;;  %v1099_v50 = vpop.f32.mrf.mxu2  ;;  %v1152_v51 = vpop.f32.mrf.mxu3 }
 0x281   : > { %v1170_v53 = vmul.f32 0.35355338, %v1099_v50  ;;  %v1174_v54 = vmul.f32 0.35355338, %v1152_v51  ;;  %v1215_v9 = vsel %vm478_vm0, %v2800_v34, 0.0  ;;  %v1216_v10 = vsel %vm478_vm0, %v2802_v23, 0.0 }
 0x282   : > { %v1236_v57 = vmul.f32 %v2791_v46, %v1207_v49 }
 0x283   : > { %v1194_v59 = vmul.f32 %v1182_v29, %v1170_v53  ;;  %v1198_v60 = vmul.f32 %v1182_v29, %v1174_v54 }
 0x284   : > { %v2804_v61 = vsub.f32 %v1185_v14, %v1236_v57  ;;  %v2806_v62 = vsub.f32 %v1189_v15, %v1236_v57  ;;  %v2808_v33 = vsub.f32 %v1193_v31, %v1236_v57  ;;  %v2810_v63 = vsub.f32 %v1197_v32, %v1236_v57 }
 0x285   : > { %v1211_v2 = vsel %vm478_vm0, %v1194_v59, 0.0  ;;  %v999_v3 = vpop.f32.mrf.mxu0  ;;  %v1052_v8 = vpop.f32.mrf.mxu1  ;;  %v1213_v12 = vsel %vm478_vm0, %v1198_v60, 0.0  ;;  %v1217_v31 = vadd.f32 %v1216_v10, %v1215_v9 }
 0x286   : > { %v1256_v5 = vmul.f32 %v2804_v61, %v2804_v61  ;;  %v1260_v6 = vmul.f32 %v2806_v62, %v2806_v62  ;;  %v1264_v7 = vmul.f32 %v2808_v33, %v2808_v33  ;;  %v1212_v11 = vadd.f32 %v1211_v2, %v1210_v0 }
 0x287   : > { %v1268_v14 = vmul.f32 %v2810_v63, %v2810_v63  ;;  %v1164_v17 = vmul.f32 0.35355338, %v999_v3  ;;  %v1168_v25 = vmul.f32 0.35355338, %v1052_v8 }
 0x288   : > { %v1272_v15 = vsel %vm478_vm0, %v1256_v5, 0.0  ;;  %v1273_v16 = vsel %vm478_vm0, %v1260_v6, 0.0  ;;  %v1102_v19 = vpop.f32.mrf.mxu2  ;;  %v1155_v20 = vpop.f32.mrf.mxu3  ;;  %v1214_v22 = vadd.f32 %v1213_v12, %v1212_v11  ;;  %v1275_v26 = vsel %vm478_vm0, %v1264_v7, 0.0 }
 0x289   : > { %v1274_v21 = vadd.f32 %v1273_v16, %v1272_v15  ;;  %v1171_v27 = vmul.f32 0.35355338, %v1102_v19  ;;  %v1175_v28 = vmul.f32 0.35355338, %v1155_v20  ;;  %v1277_v35 = vsel %vm478_vm0, %v1268_v14, 0.0 }
 0x28a   : > { %v1237_v32 = vmul.f32 %v2791_v46, %v1214_v22  ;;  %v1188_v36 = vmul.f32 %v1184_v4, %v1164_v17  ;;  %v1192_v43 = vmul.f32 %v1184_v4, %v1168_v25 }
 0x28b   : > { %v1276_v29 = vadd.f32 %v1275_v26, %v1274_v21  ;;  %v1195_v37 = vmul.f32 %v1183_v44, %v1171_v27  ;;  %v1199_v38 = vmul.f32 %v1183_v44, %v1175_v28 }
 0x28c   : > { %v2838_v39 = vsub.f32 %v1186_v41, %v1237_v32  ;;  %v2840_v40 = vsub.f32 %v1190_v42, %v1237_v32  ;;  %v2842_v45 = vsub.f32 %v1198_v60, %v1237_v32  ;;  %v2845_v13 = vsub.f32 %v1194_v59, %v1237_v32 }
 0x28d   : > { %v1278_v24 = vadd.f32 %v1277_v35, %v1276_v29  ;;  %v1218_v47 = vsel %vm478_vm0, %v1195_v37, 0.0  ;;  %v1222_v44 = vsel %vm478_vm0, %v1188_v36, 0.0  ;;  %v1220_v41 = vsel %vm478_vm0, %v1199_v38, 0.0 }
 0x28e   : > { %v1219_v49 = vadd.f32 %v1218_v47, %v1217_v31  ;;  %v1257_v50 = vmul.f32 %v2838_v39, %v2838_v39  ;;  %v1261_v42 = vmul.f32 %v2840_v40, %v2840_v40  ;;  %v1265_v51 = vmul.f32 %v2845_v13, %v2845_v13 }
 0x28f   : > { %v1307_v48 = vmul.f32 %v2834_v30, %v1278_v24  ;;  %v1223_v53 = vsel %vm478_vm0, %v1192_v43, 0.0  ;;  %v1269_v58 = vmul.f32 %v2842_v45, %v2842_v45 }
 0x290   : > { %v1221_v54 = vadd.f32 %v1220_v41, %v1219_v49  ;;  %v1279_v57 = vsel %vm478_vm0, %v1257_v50, 0.0  ;;  %v1280_v0 = vsel %vm478_vm0, %v1261_v42, 0.0  ;;  %v1282_v6 = vsel %vm478_vm0, %v1265_v51, 0.0 }
 0x291   : > { %v2856_v52 = vadd.f32 1e-06, %v1307_v48  ;;  %v1105_v55 = vpop.f32.mrf.mxu2  ;;  %v1158_v56 = vpop.f32.mrf.mxu3  ;;  %v1281_v2 = vadd.f32 %v1280_v0, %v1279_v57  ;;  %v1224_v7 = vadd.f32 %v1223_v53, %v1222_v44  ;;  %v1284_v11 = vsel %vm478_vm0, %v1269_v58, 0.0 }
 0x292   : > { %v1172_v59 = vmul.f32 0.35355338, %v1105_v55  ;;  %v1176_v60 = vmul.f32 0.35355338, %v1158_v56  ;;  %v1238_v1 = vmul.f32 %v2791_v46, %v1221_v54 }
 0x293   : > { %2266 = vrsqrt.f32 %v2856_v52  ;;  %v1283_v10 = vadd.f32 %v1282_v6, %v1281_v2  ;;  %vm1321_vm3 = vweird.f32 %v2856_v52 }
 0x294   : > { %v1196_v3 = vmul.f32 %v1184_v4, %v1172_v59  ;;  %v1200_v5 = vmul.f32 %v1184_v4, %v1176_v60  ;;  %v2867_v8 = vsub.f32 %v2800_v34, %v1238_v1  ;;  %v2870_v9 = vsub.f32 %v2802_v23, %v1238_v1 }
 0x295   : > { %v2874_v14 = vsub.f32 %v1195_v37, %v1238_v1  ;;  %v2876_v15 = vsub.f32 %v1199_v38, %v1238_v1  ;;  %v1285_v4 = vadd.f32 %v1284_v11, %v1283_v10 }
 0x296   : > { %v1225_v12 = vsel %vm478_vm0, %v1196_v3, 0.0  ;;  %v1258_v17 = vmul.f32 %v2867_v8, %v2867_v8  ;;  %v1227_v34 = vsel %vm478_vm0, %v1200_v5, 0.0  ;;  %v1262_v23 = vmul.f32 %v2870_v9, %v2870_v9 }
 0x297   : > { %v1226_v16 = vadd.f32 %v1225_v12, %v1224_v7  ;;  %v1308_v21 = vmul.f32 %v2834_v30, %v1285_v4  ;;  %v1266_v22 = vmul.f32 %v2874_v14, %v2874_v14  ;;  %v1270_v28 = vmul.f32 %v2876_v15, %v2876_v15 }
 0x298   : > { %v1286_v25 = vsel %vm478_vm0, %v1258_v17, 0.0  ;;  %v1287_v27 = vsel %vm478_vm0, %v1262_v23, 0.0 }
 0x299   : > { %v2267_v19 = vpop.eup %2266  ;;  %v1228_v20 = vadd.f32 %v1227_v34, %v1226_v16  ;;  %v1312_v31 = vadd.f32 1e-06, %v1308_v21  ;;  %v1288_v32 = vadd.f32 %v1287_v27, %v1286_v25  ;;  %v1289_v24 = vsel %vm478_vm0, %v1266_v22, 0.0  ;;  %v1372_v21 = vld [vmem:[%s3217_s2 + $0x8] sm:$0xff] }
 0x29a   : > { %v1316_v26 = vmul.f32 %v2267_v19, %v2856_v52  ;;  %v1291_v50 = vsel %vm478_vm0, %v1270_v28, 0.0  ;;  %vm1322_vm2 = vweird.f32 %v2267_v19  ;;  %vm1376_vm9 = vcmp.gt.f32.partialorder %v1372_v21, 0.0 }
 0x29b   : > { %v1239_v29 = vmul.f32 %v2791_v46, %v1228_v20  ;;  %2268 = vrsqrt.f32 %v1312_v31  ;;  %v1290_v48 = vadd.f32 %v1289_v24, %v1288_v32  ;;  %vm1323_vm4 = vmor %vm1321_vm3, %vm1322_vm2  ;;  %vm1331_vm7 = vweird.f32 %v1312_v31 }
 0x29c   : > { %v1317_v35 = vmul.f32 %v2267_v19, %v1316_v26 }
 0x29d   : > { %v2892_v37 = vsub.f32 %v1188_v36, %v1239_v29  ;;  %v2894_v38 = vsub.f32 %v1192_v43, %v1239_v29  ;;  %v2897_v49 = vsub.f32 %v1196_v3, %v1239_v29  ;;  %v2904_v41 = vsub.f32 %v1200_v5, %v1239_v29  ;;  %v1371_v43 = vld [vmem:[%s3217_s2] sm:$0xff] }
 0x29e   : > { %v1318_v47 = vmul.f32 0.5, %v1317_v35  ;;  %v1292_v42 = vadd.f32 %v1291_v50, %v1290_v48  ;;  %vm1375_vm5 = vcmp.gt.f32.partialorder %v1371_v43, 0.0 }
 0x29f   : > { %v1259_v44 = vmul.f32 %v2892_v37, %v2892_v37  ;;  %v1263_v46 = vmul.f32 %v2894_v38, %v2894_v38  ;;  %v1267_v51 = vmul.f32 %v2897_v49, %v2897_v49  ;;  %v1271_v59 = vmul.f32 %v2904_v41, %v2904_v41 }
 0x2a0   : > { %v1319_v36 = vsub.f32 1.5, %v1318_v47  ;;  %v1309_v56 = vmul.f32 %v2834_v30, %v1292_v42 }
 0x2a1   : > { %v1293_v53 = vsel %vm478_vm0, %v1259_v44, 0.0  ;;  %v1294_v54 = vsel %vm478_vm0, %v1263_v46, 0.0  ;;  %v2269_v58 = vpop.eup %2268  ;;  %v1296_v5 = vsel %vm478_vm0, %v1267_v51, 0.0  ;;  %v1298_v11 = vsel %vm478_vm0, %v1271_v59, 0.0 }
 0x2a2   : > { %v1320_v55 = vmul.f32 %v2267_v19, %v1319_v36  ;;  %v1295_v57 = vadd.f32 %v1294_v54, %v1293_v53  ;;  %v1326_v0 = vmul.f32 %v2269_v58, %v1312_v31  ;;  %v1313_v1 = vadd.f32 1e-06, %v1309_v56 }
 0x2a3   : > { %vm1332_vm6 = vweird.f32 %v2269_v58 }
 0x2a4   : > { %v1324_v60 = vsel %vm1323_vm4, %v2267_v19, %v1320_v55  ;;  %v1327_v6 = vmul.f32 %v2269_v58, %v1326_v0  ;;  %2270 = vrsqrt.f32 %v1313_v1  ;;  %v1297_v52 = vadd.f32 %v1296_v5, %v1295_v57  ;;  %vm1333_vm8 = vmor %vm1331_vm7, %vm1332_vm6 }
 0x2a5   : > { %v1367_v2 = vmul.f32 %v1324_v60, %v2810_v63  ;;  %v1363_v3 = vmul.f32 %v1324_v60, %v2808_v33  ;;  %v1359_v33 = vmul.f32 %v1324_v60, %v2806_v62  ;;  %v1355_v16 = vmul.f32 %v1324_v60, %v2804_v61 }
 0x2a6   : > { %v1328_v4 = vmul.f32 0.5, %v1327_v6  ;;  %v1299_v17 = vadd.f32 %v1298_v11, %v1297_v52  ;;  %vm1341_vm11 = vweird.f32 %v1313_v1 }
 0x2a7   : > { %v2921_v7 = vsel %vm1375_vm5, %v1367_v2, -1e+30  ;;  %v2924_v10 = vsel %vm1375_vm5, %v1363_v3, -1e+30  ;;  %v2935_v20 = vsel %vm1375_vm5, %v1359_v33, -1e+30 }
 0x2a8   : > { %v1439_v12 = vsel %vm478_vm0, %v2921_v7, -inf  ;;  %v1427_v63 = vsel %vm478_vm0, %v2924_v10, -inf  ;;  %v1329_v34 = vsub.f32 1.5, %v1328_v4  ;;  %v1310_v23 = vmul.f32 %v2834_v30, %v1299_v17 }
 0x2a9   : > { %1440 = vmax.xlane.f32.xlu0 %v1439_v12  ;;  %1428 = vmax.xlane.f32.xlu2 %v1427_v63  ;;  %v2941_v62 = vsel %vm1375_vm5, %v1355_v16, -1e+30  ;;  %v1415_v30 = vsel %vm478_vm0, %v2935_v20, -inf }
 0x2aa   : > { %v2271_v19 = vpop.eup %2270  ;;  %v1330_v22 = vmul.f32 %v2269_v58, %v1329_v34  ;;  %v1314_v25 = vadd.f32 1e-06, %v1310_v23  ;;  %v1403_v28 = vsel %vm478_vm0, %v2941_v62, -inf }
 0x2ab   : > { %v1336_v61 = vmul.f32 %v2271_v19, %v1313_v1  ;;  %vm1342_vm10 = vweird.f32 %v2271_v19 }
 0x2ac   : > { %v1334_v26 = vsel %vm1333_vm8, %v2269_v58, %v1330_v22  ;;  %2272 = vrsqrt.f32 %v1314_v25  ;;  %vm1343_vm12 = vmor %vm1341_vm11, %vm1342_vm10  ;;  %vm1351_vm1 = vweird.f32 %v1314_v25 }
 0x2ad   : > { %v1337_v27 = vmul.f32 %v2271_v19, %v1336_v61  ;;  %v1364_v29 = vmul.f32 %v1334_v26, %v2845_v13  ;;  %v1356_v31 = vmul.f32 %v1334_v26, %v2838_v39  ;;  %v1368_v48 = vmul.f32 %v1334_v26, %v2842_v45  ;;  %v1373_v13 = vld [vmem:[%s3217_s2 + $0x10] sm:$0xff] }
 0x2ae   : > { %vm1377_vm13 = vcmp.gt.f32.partialorder %v1373_v13, 0.0  ;;  %v1360_v57 = vmul.f32 %v1334_v26, %v2840_v40 }
 0x2af   : > { %v1338_v32 = vmul.f32 0.5, %v1337_v27  ;;  %v2950_v35 = vsel %vm1376_vm9, %v1364_v29, -1e+30  ;;  %v2959_v44 = vsel %vm1376_vm9, %v1356_v31, -1e+30 }
 0x2b0   : > { %v1430_v24 = vsel %vm478_vm0, %v2950_v35, -inf  ;;  %v2962_v43 = vsel %vm1376_vm9, %v1368_v48, -1e+30  ;;  %v1406_v45 = vsel %vm478_vm0, %v2959_v44, -inf  ;;  %v2980_v0 = vsel %vm1376_vm9, %v1360_v57, -1e+30 }
 0x2b1   : > { %1416 = vmax.xlane.f32.xlu0 %v1415_v30  ;;  %1404 = vmax.xlane.f32.xlu2 %v1403_v28  ;;  %v1339_v47 = vsub.f32 1.5, %v1338_v32  ;;  %v1442_v55 = vsel %vm478_vm0, %v2962_v43, -inf }
 0x2b2   : > { %1431 = vmax.xlane.f32.xlu1 %v1430_v24  ;;  %v2273_v50 = vpop.eup %2272 }
 0x2b3   : > { %v1340_v39 = vmul.f32 %v2271_v19, %v1339_v47  ;;  %v1346_v46 = vmul.f32 %v2273_v50, %v1314_v25  ;;  %vm1352_vm15 = vweird.f32 %v2273_v50 }
 0x2b4   : > { %vm1353_vm2 = vmor %vm1351_vm1, %vm1352_vm15 }
 0x2b5   : > { %v1344_v36 = vsel %vm1343_vm12, %v2271_v19, %v1340_v39  ;;  %v1347_v51 = vmul.f32 %v2273_v50, %v1346_v46 }
 0x2b6   : > { %v1365_v42 = vmul.f32 %v1344_v36, %v2874_v14  ;;  %v1369_v58 = vmul.f32 %v1344_v36, %v2876_v15  ;;  %v1374_v14 = vld [vmem:[%s3217_s2 + $0x18] sm:$0xff]  ;;  %v1418_v15 = vsel %vm478_vm0, %v2980_v0, -inf  ;;  %v1361_v52 = vmul.f32 %v1344_v36, %v2870_v9 }
 0x2b7   : > { %v1348_v54 = vmul.f32 0.5, %v1347_v51  ;;  %vm1378_vm3 = vcmp.gt.f32.partialorder %v1374_v14, 0.0  ;;  %v1357_v11 = vmul.f32 %v1344_v36, %v2867_v8 }
 0x2b8   : > { %v2968_v53 = vsel %vm1377_vm13, %v1365_v42, -1e+30  ;;  %v2983_v1 = vsel %vm1377_vm13, %v1369_v58, -1e+30  ;;  %v2999_v12 = vsel %vm1377_vm13, %v1361_v52, -1e+30 }
 0x2b9   : > { %1407 = vmax.xlane.f32.xlu0 %v1406_v45  ;;  %v1433_v56 = vsel %vm478_vm0, %v2968_v53, -inf  ;;  %v1349_v59 = vsub.f32 1.5, %v1348_v54  ;;  %v1445_v3 = vsel %vm478_vm0, %v2983_v1, -inf  ;;  %v3002_v63 = vsel %vm1377_vm13, %v1357_v11, -1e+30 }
 0x2ba   : > { %1443 = vmax.xlane.f32.xlu1 %v1442_v55  ;;  %1434 = vmax.xlane.f32.xlu2 %v1433_v56  ;;  %v1421_v16 = vsel %vm478_vm0, %v2999_v12, -inf  ;;  %v1409_v9 = vsel %vm478_vm0, %v3002_v63, -inf }
 0x2bb   : > { %v1350_v60 = vmul.f32 %v2273_v50, %v1349_v59 }
 0x2bd   : > { %v1354_v2 = vsel %vm1353_vm2, %v2273_v50, %v1350_v60 }
 0x2be   : > { %v1366_v40 = vmul.f32 %v1354_v2, %v2897_v49  ;;  %v1370_v49 = vmul.f32 %v1354_v2, %v2904_v41  ;;  %v1362_v41 = vmul.f32 %v1354_v2, %v2894_v38  ;;  %v1358_v4 = vmul.f32 %v1354_v2, %v2892_v37 }
 0x2c0   : > { %v2991_v5 = vsel %vm1378_vm3, %v1366_v40, -1e+30  ;;  %v3005_v33 = vsel %vm1378_vm3, %v1370_v49, -1e+30  ;;  %v3016_v17 = vsel %vm1378_vm3, %v1362_v41, -1e+30 }
 0x2c1   : > { %v1436_v6 = vsel %vm478_vm0, %v2991_v5, -inf  ;;  %v1448_v8 = vsel %vm478_vm0, %v3005_v33, -inf  ;;  %v3019_v34 = vsel %vm1378_vm3, %v1358_v4, -1e+30  ;;  %v1424_v23 = vsel %vm478_vm0, %v3016_v17, -inf }
 0x2c2   : > { %1419 = vmax.xlane.f32.xlu1 %v1418_v15  ;;  %1446 = vmax.xlane.f32.xlu2 %v1445_v3  ;;  %v1412_v19 = vsel %vm478_vm0, %v3019_v34, -inf }
 0x2c3   : > { %1437 = vmax.xlane.f32.xlu0 %v1436_v6 }
 0x2ca   : > { %1422 = vmax.xlane.f32.xlu2 %v1421_v16  ;;  %1410 = vmax.xlane.f32.xlu1 %v1409_v9 }
 0x2cb   : > { %1449 = vmax.xlane.f32.xlu0 %v1448_v8 }
 0x2d2   : > { %1425 = vmax.xlane.f32.xlu2 %v1424_v23  ;;  %1413 = vmax.xlane.f32.xlu1 %v1412_v19 }
 0x31c   : > { %v1441_v21 = vpop.xlane.xlu0 %1440  ;;  %v1429_v22 = vpop.xlane.xlu2 %1428 }
 0x31d   : > { %v1463_v38 = vsub.f32 %v2921_v7, %v1441_v21  ;;  %v1459_v37 = vsub.f32 %v2924_v10, %v1429_v22 }
 0x31f   : > { %v1491_v61 = vmul.f32 1.442695, %v1463_v38  ;;  %v1483_v25 = vmul.f32 1.442695, %v1459_v37 }
 0x321   : > { %2274 = vpow2.f32 %v1491_v61 }
 0x322   : > { %2276 = vpow2.f32 %v1483_v25 }
 0x324   : > { %v1417_v26 = vpop.xlane.xlu0 %1416  ;;  %v1405_v27 = vpop.xlane.xlu2 %1404 }
 0x325   : > { %v1455_v30 = vsub.f32 %v2935_v20, %v1417_v26  ;;  %v1451_v28 = vsub.f32 %v2941_v62, %v1405_v27  ;;  %v1432_v24 = vpop.xlane.xlu1 %1431 }
 0x326   : > { %v1460_v7 = vsub.f32 %v2950_v35, %v1432_v24 }
 0x327   : > { %v3029_v29 = vpop.eup %2274  ;;  %v1475_v31 = vmul.f32 1.442695, %v1455_v30  ;;  %v1467_v32 = vmul.f32 1.442695, %v1451_v28 }
 0x328   : > { %v3031_v47 = vpop.eup %2276  ;;  %v1535_v10 = vsel %vm478_vm0, %v3029_v29, 0.0  ;;  %v1485_v20 = vmul.f32 1.442695, %v1460_v7 }
 0x329   : > { %2278 = vpow2.f32 %v1475_v31  ;;  %v1523_v48 = vsel %vm478_vm0, %v3031_v47, 0.0  ;;  %1536 = vadd.xlane.f32.xlu1 %v1535_v10 }
 0x32a   : > { %2280 = vpow2.f32 %v1467_v32  ;;  %1524 = vadd.xlane.f32.xlu0 %v1523_v48 }
 0x32b   : > { %2282 = vpow2.f32 %v1485_v20 }
 0x32c   : > { %v1408_v62 = vpop.xlane.xlu0 %1407 }
 0x32d   : > { %v1452_v13 = vsub.f32 %v2959_v44, %v1408_v62  ;;  %v1444_v39 = vpop.xlane.xlu1 %1443  ;;  %v1435_v35 = vpop.xlane.xlu2 %1434 }
 0x32e   : > { %v1464_v45 = vsub.f32 %v2962_v43, %v1444_v39  ;;  %v1461_v42 = vsub.f32 %v2968_v53, %v1435_v35 }
 0x32f   : > { %v3039_v50 = vpop.eup %2278  ;;  %v1469_v46 = vmul.f32 1.442695, %v1452_v13 }
 0x330   : > { %v3041_v36 = vpop.eup %2280  ;;  %v1511_v51 = vsel %vm478_vm0, %v3039_v50, 0.0  ;;  %v1493_v55 = vmul.f32 1.442695, %v1464_v45  ;;  %v1487_v56 = vmul.f32 1.442695, %v1461_v42 }
 0x331   : > { %2284 = vpow2.f32 %v1469_v46  ;;  %v1499_v54 = vsel %vm478_vm0, %v3041_v36, 0.0  ;;  %1512 = vadd.xlane.f32.xlu1 %v1511_v51  ;;  %v3049_v44 = vpop.eup %2282 }
 0x332   : > { %1500 = vadd.xlane.f32.xlu0 %v1499_v54  ;;  %v1526_v57 = vsel %vm478_vm0, %v3049_v44, 0.0  ;;  %2286 = vpow2.f32 %v1493_v55 }
 0x333   : > { %1527 = vadd.xlane.f32.xlu2 %v1526_v57  ;;  %2288 = vpow2.f32 %v1487_v56 }
 0x335   : > { %v1420_v53 = vpop.xlane.xlu1 %1419  ;;  %v1447_v58 = vpop.xlane.xlu2 %1446 }
 0x336   : > { %v1456_v59 = vsub.f32 %v2980_v0, %v1420_v53  ;;  %v1465_v14 = vsub.f32 %v2983_v1, %v1447_v58  ;;  %v1438_v60 = vpop.xlane.xlu0 %1437 }
 0x337   : > { %v3053_v43 = vpop.eup %2284  ;;  %v1462_v40 = vsub.f32 %v2991_v5, %v1438_v60  ;;  %v475_v60 = vld [vmem:[%s2445_s26 + $0x10] sm:$0xff] }
 0x338   : > { %v1502_v2 = vsel %vm478_vm0, %v3053_v43, 0.0  ;;  %v3060_v15 = vpop.eup %2286  ;;  %v1477_v3 = vmul.f32 1.442695, %v1456_v59  ;;  %v1495_v6 = vmul.f32 1.442695, %v1465_v14  ;;  %1852 = vmatpush.msrb.mxu2 %v475_v60 }
 0x339   : > { %1503 = vadd.xlane.f32.xlu1 %v1502_v2  ;;  %v3062_v52 = vpop.eup %2288  ;;  %v1489_v11 = vmul.f32 1.442695, %v1462_v40  ;;  %v1538_v49 = vsel %vm478_vm0, %v3060_v15, 0.0  ;;  %v476_v2 = vld [vmem:[%s2445_s26 + $0x18] sm:$0xff]  ;;  %v473_v40 = vld [vmem:[%s2445_s26] sm:$0xff] }
 0x33a   : > { %2290 = vpow2.f32 %v1477_v3  ;;  %v1529_v0 = vsel %vm478_vm0, %v3062_v52, 0.0  ;;  %1893 = vmatpush.msrb.mxu3 %v476_v2  ;;  %v474_v3 = vld [vmem:[%s2445_s26 + $0x8] sm:$0xff]  ;;  %1770 = vmatpush.msrb.mxu0 %v473_v40 }
 0x33b   : > { %1539 = vadd.xlane.f32.xlu2 %v1538_v49  ;;  %2292 = vpow2.f32 %v1495_v6  ;;  %1530 = vadd.xlane.f32.xlu0 %v1529_v0 }
 0x33c   : > { %2294 = vpow2.f32 %v1489_v11  ;;  %1811 = vmatpush.msrb.mxu1 %v474_v3  ;;  %v2339_v3 = vld [vmem:[#allocation2] sm:$0xff] }
 0x33d   : > { %v1423_v1 = vpop.xlane.xlu2 %1422  ;;  %v1411_v5 = vpop.xlane.xlu1 %1410 }
 0x33e   : > { %v1457_v16 = vsub.f32 %v2999_v12, %v1423_v1  ;;  %v1453_v9 = vsub.f32 %v3002_v63, %v1411_v5  ;;  %v1450_v8 = vpop.xlane.xlu0 %1449 }
 0x33f   : > { %v1466_v41 = vsub.f32 %v3005_v33, %v1450_v8 }
 0x340   : > { %v3071_v4 = vpop.eup %2290  ;;  %v1479_v23 = vmul.f32 1.442695, %v1457_v16  ;;  %v1471_v19 = vmul.f32 1.442695, %v1453_v9 }
 0x341   : > { %v3073_v21 = vpop.eup %2292  ;;  %v1497_v22 = vmul.f32 1.442695, %v1466_v41  ;;  %v1514_v38 = vsel %vm478_vm0, %v3071_v4, 0.0 }
 0x342   : > { %v3077_v37 = vpop.eup %2294  ;;  %2296 = vpow2.f32 %v1479_v23  ;;  %v1541_v12 = vsel %vm478_vm0, %v3073_v21, 0.0 }
 0x343   : > { %1515 = vadd.xlane.f32.xlu2 %v1514_v38  ;;  %2298 = vpow2.f32 %v1471_v19  ;;  %1542 = vadd.xlane.f32.xlu0 %v1541_v12  ;;  %v1532_v63 = vsel %vm478_vm0, %v3077_v37, 0.0 }
 0x344   : > { %2300 = vpow2.f32 %v1497_v22  ;;  %1533 = vadd.xlane.f32.xlu1 %v1532_v63 }
 0x345   : > { %v1426_v33 = vpop.xlane.xlu2 %1425  ;;  %v1414_v61 = vpop.xlane.xlu1 %1413 }
 0x346   : > { %v1458_v25 = vsub.f32 %v3016_v17, %v1426_v33  ;;  %v1454_v26 = vsub.f32 %v3019_v34, %v1414_v61 }
 0x348   : > { %v3085_v27 = vpop.eup %2296  ;;  %v1481_v30 = vmul.f32 1.442695, %v1458_v25  ;;  %v1473_v28 = vmul.f32 1.442695, %v1454_v26 }
 0x349   : > { %v3087_v31 = vpop.eup %2298  ;;  %v1517_v32 = vsel %vm478_vm0, %v3085_v27, 0.0 }
 0x34a   : > { %v3091_v24 = vpop.eup %2300  ;;  %2302 = vpow2.f32 %v1481_v30  ;;  %v1505_v7 = vsel %vm478_vm0, %v3087_v31, 0.0 }
 0x34b   : > { %2304 = vpow2.f32 %v1473_v28  ;;  %1518 = vadd.xlane.f32.xlu0 %v1517_v32  ;;  %1506 = vadd.xlane.f32.xlu2 %v1505_v7  ;;  %v1544_v17 = vsel %vm478_vm0, %v3091_v24, 0.0 }
 0x34c   : > { %1545 = vadd.xlane.f32.xlu1 %v1544_v17 }
 0x350   : > { %v3097_v34 = vpop.eup %2302 }
 0x351   : > { %v3099_v10 = vpop.eup %2304  ;;  %v1520_v48 = vsel %vm478_vm0, %v3097_v34, 0.0 }
 0x352   : > { %v1508_v20 = vsel %vm478_vm0, %v3099_v10, 0.0 }
 0x353   : > { %1521 = vadd.xlane.f32.xlu0 %v1520_v48  ;;  %1509 = vadd.xlane.f32.xlu2 %v1508_v20 }
 0x39c   : > { %v1537_v62 = vpop.xlane.xlu1 %1536 }
 0x39d   : > { %v1525_v13 = vpop.xlane.xlu0 %1524  ;;  %2306 = vrcp.f32 %v1537_v62 }
 0x39e   : > { %2308 = vrcp.f32 %v1525_v13 }
 0x3a3   : > { %v2307_v39 = vpop.eup %2306 }
 0x3a4   : > { %v2309_v46 = vpop.eup %2308  ;;  %v1575_v35 = vmul.f32 %v2307_v39, %v3029_v29  ;;  %v1513_v45 = vpop.xlane.xlu1 %1512 }
 0x3a5   : > { %v1571_v42 = vmul.f32 %v2309_v46, %v3031_v47  ;;  %v1501_v51 = vpop.xlane.xlu0 %1500  ;;  %2310 = vrcp.f32 %v1513_v45 }
 0x3a6   : > { %2312 = vrcp.f32 %v1501_v51  ;;  %2213 = vmatmul.msk.f32.vlgmr.msra.gmra.mxu3 %vm478_vm0, %v1575_v35  ;;  %v1528_v54 = vpop.xlane.xlu2 %1527 }
 0x3a7   : > { %2209 = vmatmul.msk.f32.vlgmr.msra.gmra.mxu2 %vm478_vm0, %v1571_v42  ;;  %2314 = vrcp.f32 %v1528_v54 }
 0x3ab   : > { %v2311_v55 = vpop.eup %2310 }
 0x3ac   : > { %v2313_v56 = vpop.eup %2312  ;;  %v1567_v57 = vmul.f32 %v2311_v55, %v3039_v50  ;;  %v1504_v29 = vpop.xlane.xlu1 %1503 }
 0x3ad   : > { %v1563_v53 = vmul.f32 %v2313_v56, %v3041_v36  ;;  %2316 = vrcp.f32 %v1504_v29  ;;  %v2315_v47 = vpop.eup %2314  ;;  %v2251_v29 = vld [vmem:[%s406_s29] ss:$0 sm:$0xff] }
 0x3ae   : > { %2205 = vmatmul.msk.f32.vlgmr.msra.gmra.mxu1 %vm478_vm0, %v1567_v57  ;;  %v1540_v58 = vpop.xlane.xlu2 %1539  ;;  %v1572_v59 = vmul.f32 %v2315_v47, %v3049_v44  ;;  %v1531_v14 = vpop.xlane.xlu0 %1530 }
 0x3af   : > { %2201 = vmatmul.msk.f32.vlgmr.msra.gmra.mxu0 %vm478_vm0, %v1563_v53  ;;  %2318 = vrcp.f32 %v1540_v58  ;;  %v2338_v53 = vld [vmem:[#allocation2 + $0x10] sm:$0xff] }
 0x3b0   : > { %2320 = vrcp.f32 %v1531_v14  ;;  %2210 = vmatmul.msk.f32.gmra.mxu2 %vm478_vm0, %v1572_v59 }
 0x3b3   : > { %v2317_v50 = vpop.eup %2316 }
 0x3b4   : > { %v1564_v36 = vmul.f32 %v2317_v50, %v3053_v43 }
 0x3b5   : > { %v2319_v6 = vpop.eup %2318 }
 0x3b6   : > { %v2321_v11 = vpop.eup %2320  ;;  %v1516_v49 = vpop.xlane.xlu2 %1515  ;;  %v1576_v44 = vmul.f32 %v2319_v6, %v3060_v15 }
 0x3b7   : > { %2202 = vmatmul.msk.f32.gmra.mxu0 %vm478_vm0, %v1564_v36  ;;  %v1543_v0 = vpop.xlane.xlu0 %1542  ;;  %2322 = vrcp.f32 %v1516_v49  ;;  %v1573_v1 = vmul.f32 %v2321_v11, %v3062_v52  ;;  %v1534_v5 = vpop.xlane.xlu1 %1533 }
 0x3b8   : > { %2324 = vrcp.f32 %v1543_v0  ;;  %2214 = vmatmul.msk.f32.gmra.mxu3 %vm478_vm0, %v1576_v44 }
 0x3b9   : > { %2326 = vrcp.f32 %v1534_v5  ;;  %2211 = vmatmul.msk.f32.gmra.mxu2 %vm478_vm0, %v1573_v1 }
 0x3bd   : > { %v2323_v43 = vpop.eup %2322 }
 0x3be   : > { %v2325_v16 = vpop.eup %2324  ;;  %v1568_v9 = vmul.f32 %v2323_v43, %v3071_v4  ;;  %v1507_v23 = vpop.xlane.xlu2 %1506 }
 0x3bf   : > { %v2327_v8 = vpop.eup %2326  ;;  %v1519_v41 = vpop.xlane.xlu0 %1518  ;;  %v1577_v15 = vmul.f32 %v2325_v16, %v3073_v21 }
 0x3c0   : > { %2328 = vrcp.f32 %v1519_v41  ;;  %v1546_v19 = vpop.xlane.xlu1 %1545  ;;  %2206 = vmatmul.msk.f32.gmra.mxu1 %vm478_vm0, %v1568_v9  ;;  %v1574_v52 = vmul.f32 %v2327_v8, %v3077_v37  ;;  %v2340_v9 = vld [vmem:[#allocation2 + $0x18] sm:$0xff] }
 0x3c1   : > { %2330 = vrcp.f32 %v1507_v23  ;;  %2215 = vmatmul.msk.f32.gmra.mxu3 %vm478_vm0, %v1577_v15 }
 0x3c2   : > { %2332 = vrcp.f32 %v1546_v19  ;;  %2212 = vmatmul.msk.f32.gmra.mxu2 %vm478_vm0, %v1574_v52 }
 0x3c6   : > { %v2329_v22 = vpop.eup %2328  ;;  %v1510_v12 = vpop.xlane.xlu2 %1509 }
 0x3c7   : > { %v2331_v38 = vpop.eup %2330  ;;  %v1522_v4 = vpop.xlane.xlu0 %1521  ;;  %v1569_v63 = vmul.f32 %v2329_v22, %v3085_v27 }
 0x3c8   : > { %v2333_v33 = vpop.eup %2332  ;;  %2334 = vrcp.f32 %v1522_v4  ;;  %v1565_v21 = vmul.f32 %v2331_v38, %v3087_v31 }
 0x3c9   : > { %2336 = vrcp.f32 %v1510_v12  ;;  %2207 = vmatmul.msk.f32.gmra.mxu1 %vm478_vm0, %v1569_v63  ;;  %v1578_v37 = vmul.f32 %v2333_v33, %v3091_v24  ;;  %v2341_v12 = vld [vmem:[#allocation2 + $0x8] sm:$0xff] }
 0x3ca   : > { %2203 = vmatmul.msk.f32.gmra.mxu0 %vm478_vm0, %v1565_v21 }
 0x3cb   : > { %2216 = vmatmul.msk.f32.gmra.mxu3 %vm478_vm0, %v1578_v37 }
 0x3ce   : > { %v2335_v61 = vpop.eup %2334 }
 0x3cf   : > { %v2337_v25 = vpop.eup %2336  ;;  %v1570_v26 = vmul.f32 %v2335_v61, %v3097_v34 }
 0x3d0   : > { %v1566_v30 = vmul.f32 %v2337_v25, %v3099_v10 }
 0x3d1   : > { %2208 = vmatmul.msk.f32.gmra.mxu1 %vm478_vm0, %v1570_v26 }
 0x3d2   : > { %2204 = vmatmul.msk.f32.gmra.mxu0 %vm478_vm0, %v1566_v30 }
 0x429   : > { %v1731_v27 = vpop.f32.mrf.mxu3 }
 0x42a   : > { %v1690_v28 = vpop.f32.mrf.mxu2  ;;  %2229 = vmatmul.msk.f32.vlgmr.msrb.gmra.mxu3 %vm948_vm14, %v1731_v27 }
 0x42b   : > { %2225 = vmatmul.msk.f32.vlgmr.msrb.gmra.mxu2 %vm948_vm14, %v1690_v28  ;;  %v1649_v31 = vpop.f32.mrf.mxu1 }
 0x42c   : > { %v1608_v32 = vpop.f32.mrf.mxu0  ;;  %2221 = vmatmul.msk.f32.vlgmr.msrb.gmra.mxu1 %vm948_vm14, %v1649_v31 }
 0x42d   : > { %2217 = vmatmul.msk.f32.vlgmr.msrb.gmra.mxu0 %vm948_vm14, %v1608_v32 }
 0x433   : > { %v1693_v24 = vpop.f32.mrf.mxu2 }
 0x434   : > { %v1611_v7 = vpop.f32.mrf.mxu0  ;;  %2226 = vmatmul.msk.f32.gmra.mxu2 %vm948_vm14, %v1693_v24 }
 0x435   : > { %2218 = vmatmul.msk.f32.gmra.mxu0 %vm948_vm14, %v1611_v7 }
 0x43b   : > { %v1734_v17 = vpop.f32.mrf.mxu3 }
 0x43c   : > { %v1696_v34 = vpop.f32.mrf.mxu2  ;;  %2230 = vmatmul.msk.f32.gmra.mxu3 %vm948_vm14, %v1734_v17 }
 0x43d   : > { %2227 = vmatmul.msk.f32.gmra.mxu2 %vm948_vm14, %v1696_v34  ;;  %v1652_v10 = vpop.f32.mrf.mxu1 }
 0x43e   : > { %2222 = vmatmul.msk.f32.gmra.mxu1 %vm948_vm14, %v1652_v10 }
 0x444   : > { %v1737_v48 = vpop.f32.mrf.mxu3 }
 0x445   : > { %v1699_v20 = vpop.f32.mrf.mxu2  ;;  %2231 = vmatmul.msk.f32.gmra.mxu3 %vm948_vm14, %v1737_v48 }
 0x446   : > { %2228 = vmatmul.msk.f32.gmra.mxu2 %vm948_vm14, %v1699_v20  ;;  %v1655_v62 = vpop.f32.mrf.mxu1 }
 0x447   : > { %v1614_v13 = vpop.f32.mrf.mxu0  ;;  %2223 = vmatmul.msk.f32.gmra.mxu1 %vm948_vm14, %v1655_v62 }
 0x448   : > { %2219 = vmatmul.msk.f32.gmra.mxu0 %vm948_vm14, %v1614_v13 }
 0x44e   : > { %v1740_v39 = vpop.f32.mrf.mxu3  ;;  %v1658_v46 = vpop.f32.mrf.mxu1 }
 0x44f   : > { %2232 = vmatmul.msk.f32.gmra.mxu3 %vm948_vm14, %v1740_v39  ;;  %v1617_v35 = vpop.f32.mrf.mxu0  ;;  %2224 = vmatmul.msk.f32.gmra.mxu1 %vm948_vm14, %v1658_v46 }
 0x450   : > { %2220 = vmatmul.msk.f32.gmra.mxu0 %vm948_vm14, %v1617_v35 }
 0x4a9   : > { %v1813_v42 = vpop.f32.mrf.mxu1 }
 0x4aa   : > { %v1772_v45 = vpop.f32.mrf.mxu0 }
 0x4ab   : > { %v1907_v51 = vadd.f32 %v1813_v42, %v1772_v45 }
 0x4ad   : > { %v1895_v56 = vpop.f32.mrf.mxu3 }
 0x4ae   : > { %v1854_v54 = vpop.f32.mrf.mxu2 }
 0x4af   : > { %v1908_v55 = vadd.f32 %v1907_v51, %v1854_v54 }
 0x4b1   : > { %v1909_v57 = vadd.f32 %v1908_v55, %v1895_v56 }
 0x4b2   : > { %v1775_v59 = vpop.f32.mrf.mxu0 }
 0x4b3   : > { %v1919_v47 = vadd.f32 %v2338_v53, %v1909_v57 }
 0x4b5   : > { %v1926_v58 = vadd.f32 %v2251_v29, %v1919_v47 }
 0x4b7   : > { %1930 = vst [vmem:[#allocation2 + $0x10] sm:$0xff] %v1926_v58  ;;  %v1857_v14 = vpop.f32.mrf.mxu2 }
 0x4bb   : > { %v1816_v50 = vpop.f32.mrf.mxu1 }
 0x4bc   : > { %v1910_v60 = vadd.f32 %v1816_v50, %v1775_v59 }
 0x4be   : > { %v1911_v2 = vadd.f32 %v1910_v60, %v1857_v14 }
 0x4bf   : > { %v1898_v40 = vpop.f32.mrf.mxu3 }
 0x4c0   : > { %v1912_v36 = vadd.f32 %v1911_v2, %v1898_v40  ;;  %v1860_v44 = vpop.f32.mrf.mxu2 }
 0x4c2   : > { %v1920_v6 = vadd.f32 %v2339_v3, %v1912_v36 }
 0x4c4   : > { %v1927_v11 = vadd.f32 %v2251_v29, %v1920_v6  ;;  %v1819_v49 = vpop.f32.mrf.mxu1 }
 0x4c5   : > { %v1778_v0 = vpop.f32.mrf.mxu0 }
 0x4c6   : > { %1931 = vst [vmem:[#allocation2] sm:$0xff] %v1927_v11  ;;  %v1913_v1 = vadd.f32 %v1819_v49, %v1778_v0 }
 0x4c8   : > { %v1901_v5 = vpop.f32.mrf.mxu3  ;;  %v1914_v43 = vadd.f32 %v1913_v1, %v1860_v44 }
 0x4c9   : > { %v1863_v52 = vpop.f32.mrf.mxu2 }
 0x4ca   : > { %v1915_v16 = vadd.f32 %v1914_v43, %v1901_v5 }
 0x4cc   : > { %v1921_v8 = vadd.f32 %v2340_v9, %v1915_v16  ;;  %v1822_v41 = vpop.f32.mrf.mxu1 }
 0x4cd   : > { %v1781_v23 = vpop.f32.mrf.mxu0 }
 0x4ce   : > { %v1928_v15 = vadd.f32 %v2251_v29, %v1921_v8  ;;  %v1916_v19 = vadd.f32 %v1822_v41, %v1781_v23 }
 0x4d0   : > { %1932 = vst [vmem:[#allocation2 + $0x18] sm:$0xff] %v1928_v15  ;;  %v1917_v22 = vadd.f32 %v1916_v19, %v1863_v52 }
 0x4d2   : > { %v1904_v38 = vpop.f32.mrf.mxu3 }
 0x4d3   : > { %v1918_v4 = vadd.f32 %v1917_v22, %v1904_v38 }
 0x4d5   : > { %v1922_v63 = vadd.f32 %v2341_v12, %v1918_v4  ;;  %1937 = sbr.rel (%p2233_p5) target bundleno = 1520 (0x5f0), region = 68 }
 0x4d7   : > { %v1929_v33 = vadd.f32 %v2251_v29, %v1922_v63 }
 0x4d9   : > { %1933 = vst [vmem:[#allocation2 + $0x8] sm:$0xff] %v1929_v33 }
 0x4da   : > { %v1944_v21 = vsel %vm478_vm0, %v1928_v15, 0.0  ;;  %v1938_v37 = vsel %vm478_vm0, %v1926_v58, 0.0  ;;  %v1947_v61 = vsel %vm478_vm0, %v1929_v33, 0.0  ;;  %v1941_v25 = vsel %vm478_vm0, %v1927_v11, 0.0  ;;  %v2342_v16 = vld [vmem:[%s3223_s8] ss:$0 sm:$0xff] }
 0x4db   : > { %1945 = vadd.xlane.f32.xlu1 %v1944_v21  ;;  %1939 = vadd.xlane.f32.xlu0 %v1938_v37 }
 0x4e3   : > { %1948 = vadd.xlane.f32.xlu1 %v1947_v61  ;;  %1942 = vadd.xlane.f32.xlu0 %v1941_v25 }
 0x54e   : > { %v1946_v26 = vpop.xlane.xlu1 %1945  ;;  %v1940_v30 = vpop.xlane.xlu0 %1939 }
 0x54f   : > { %v1952_v27 = vmul.f32 %v1946_v26, %v2473_v18  ;;  %v1950_v28 = vmul.f32 %v1940_v30, %v2473_v18 }
 0x551   : > { %v3169_v31 = vsub.f32 %v1928_v15, %v1952_v27  ;;  %v1954_v32 = vsub.f32 %v1926_v58, %v1950_v28  ;;  %v2343_v15 = vld [vmem:[%s3224_s9] ss:$0 sm:$0xff] }
 0x553   : > { %v1960_v24 = vmul.f32 %v3169_v31, %v3169_v31  ;;  %v1958_v7 = vmul.f32 %v1954_v32, %v1954_v32 }
 0x555   : > { %v1968_v17 = vsel %vm478_vm0, %v1960_v24, 0.0  ;;  %v1962_v34 = vsel %vm478_vm0, %v1958_v7, 0.0 }
 0x556   : > { %v1949_v10 = vpop.xlane.xlu1 %1948  ;;  %1969 = vadd.xlane.f32.xlu0 %v1968_v17  ;;  %1963 = vadd.xlane.f32.xlu2 %v1962_v34  ;;  %v1943_v48 = vpop.xlane.xlu0 %1942 }
 0x557   : > { %v1953_v20 = vmul.f32 %v1949_v10, %v2473_v18  ;;  %v1951_v62 = vmul.f32 %v1943_v48, %v2473_v18 }
 0x559   : > { %v3177_v13 = vsub.f32 %v1929_v33, %v1953_v20  ;;  %v3179_v39 = vsub.f32 %v1927_v11, %v1951_v62 }
 0x55b   : > { %v1961_v46 = vmul.f32 %v3177_v13, %v3177_v13  ;;  %v1959_v35 = vmul.f32 %v3179_v39, %v3179_v39 }
 0x55d   : > { %v1971_v45 = vsel %vm478_vm0, %v1961_v46, 0.0  ;;  %v1965_v42 = vsel %vm478_vm0, %v1959_v35, 0.0 }
 0x55e   : > { %1972 = vadd.xlane.f32.xlu1 %v1971_v45  ;;  %1966 = vadd.xlane.f32.xlu2 %v1965_v42 }
 0x5c9   : > { %v1964_v51 = vpop.xlane.xlu2 %1963  ;;  %v1970_v54 = vpop.xlane.xlu0 %1969 }
 0x5ca   : > { %v1974_v55 = vmul.f32 %v1964_v51, %v2473_v18  ;;  %v1976_v56 = vmul.f32 %v1970_v54, %v2473_v18 }
 0x5cc   : > { %v1978_v57 = vadd.f32 1e-05, %v1974_v55  ;;  %v1980_v29 = vadd.f32 1e-05, %v1976_v56 }
 0x5ce   : > { %2344 = vrsqrt.f32 %v1978_v57  ;;  %vm1988_vm4 = vweird.f32 %v1978_v57  ;;  %vm2008_vm6 = vweird.f32 %v1980_v29 }
 0x5cf   : > { %2346 = vrsqrt.f32 %v1980_v29 }
 0x5d1   : > { %v1973_v53 = vpop.xlane.xlu1 %1972  ;;  %v1967_v47 = vpop.xlane.xlu2 %1966 }
 0x5d2   : > { %v1977_v58 = vmul.f32 %v1973_v53, %v2473_v18  ;;  %v1975_v59 = vmul.f32 %v1967_v47, %v2473_v18 }
 0x5d4   : > { %v2345_v14 = vpop.eup %2344  ;;  %v1981_v50 = vadd.f32 1e-05, %v1977_v58  ;;  %v1979_v60 = vadd.f32 1e-05, %v1975_v59 }
 0x5d5   : > { %v2347_v2 = vpop.eup %2346  ;;  %v1983_v40 = vmul.f32 %v2345_v14, %v1978_v57  ;;  %vm1989_vm0 = vweird.f32 %v2345_v14 }
 0x5d6   : > { %v2003_v36 = vmul.f32 %v2347_v2, %v1980_v29  ;;  %2348 = vrsqrt.f32 %v1981_v50  ;;  %vm2009_vm14 = vweird.f32 %v2347_v2  ;;  %vm1990_vm5 = vmor %vm1988_vm4, %vm1989_vm0  ;;  %vm2018_vm10 = vweird.f32 %v1981_v50 }
 0x5d7   : > { %v1984_v3 = vmul.f32 %v2345_v14, %v1983_v40  ;;  %2350 = vrsqrt.f32 %v1979_v60  ;;  %vm2010_vm7 = vmor %vm2008_vm6, %vm2009_vm14  ;;  %vm1998_vm12 = vweird.f32 %v1979_v60 }
 0x5d8   : > { %v2004_v6 = vmul.f32 %v2347_v2, %v2003_v36 }
 0x5d9   : > { %v1985_v11 = vmul.f32 0.5, %v1984_v3 }
 0x5da   : > { %v2005_v49 = vmul.f32 0.5, %v2004_v6 }
 0x5db   : > { %v1986_v44 = vsub.f32 1.5, %v1985_v11 }
 0x5dc   : > { %v2349_v0 = vpop.eup %2348  ;;  %v2006_v1 = vsub.f32 1.5, %v2005_v49 }
 0x5dd   : > { %v2351_v5 = vpop.eup %2350  ;;  %v1987_v43 = vmul.f32 %v2345_v14, %v1986_v44  ;;  %v2013_v18 = vmul.f32 %v2349_v0, %v1981_v50  ;;  %vm2019_vm8 = vweird.f32 %v2349_v0 }
 0x5de   : > { %v2007_v9 = vmul.f32 %v2347_v2, %v2006_v1  ;;  %v1993_v8 = vmul.f32 %v2351_v5, %v1979_v60  ;;  %vm1999_vm9 = vweird.f32 %v2351_v5  ;;  %vm2020_vm11 = vmor %vm2018_vm10, %vm2019_vm8 }
 0x5df   : > { %v1991_v41 = vsel %vm1990_vm5, %v2345_v14, %v1987_v43  ;;  %v2014_v23 = vmul.f32 %v2349_v0, %v2013_v18  ;;  %vm2000_vm13 = vmor %vm1998_vm12, %vm1999_vm9 }
 0x5e0   : > { %v2022_v19 = vmul.f32 %v1991_v41, %v1954_v32  ;;  %v2011_v52 = vsel %vm2010_vm7, %v2347_v2, %v2007_v9  ;;  %v1994_v22 = vmul.f32 %v2351_v5, %v1993_v8 }
 0x5e1   : > { %v2024_v38 = vmul.f32 %v2011_v52, %v3169_v31  ;;  %v2015_v4 = vmul.f32 0.5, %v2014_v23 }
 0x5e2   : > { %v2030_v12 = vmul.f32 %v2342_v16, %v2022_v19  ;;  %v1995_v63 = vmul.f32 0.5, %v1994_v22 }
 0x5e3   : > { %v2032_v33 = vmul.f32 %v2342_v16, %v2024_v38  ;;  %v2016_v21 = vsub.f32 1.5, %v2015_v4 }
 0x5e4   : > { %v2038_v37 = vadd.f32 %v2343_v15, %v2030_v12  ;;  %v1996_v61 = vsub.f32 1.5, %v1995_v63 }
 0x5e5   : > { %v2040_v25 = vadd.f32 %v2343_v15, %v2032_v33  ;;  %v2017_v26 = vmul.f32 %v2349_v0, %v2016_v21 }
 0x5e6   : > { %2042 = vst [vmem:[%s3225_s10] sm:$0xff] %v2038_v37  ;;  %v1997_v30 = vmul.f32 %v2351_v5, %v1996_v61 }
 0x5e7   : > { %2044 = vst [vmem:[%s3225_s10 + $0x10] sm:$0xff] %v2040_v25  ;;  %v2021_v27 = vsel %vm2020_vm11, %v2349_v0, %v2017_v26 }
 0x5e8   : > { %v2025_v28 = vmul.f32 %v2021_v27, %v3177_v13  ;;  %v2001_v31 = vsel %vm2000_vm13, %v2351_v5, %v1997_v30 }
 0x5e9   : > { %v2023_v32 = vmul.f32 %v2001_v31, %v3179_v39 }
 0x5ea   : > { %v2033_v24 = vmul.f32 %v2342_v16, %v2025_v28 }
 0x5eb   : > { %v2031_v7 = vmul.f32 %v2342_v16, %v2023_v32 }
 0x5ec   : > { %v2041_v17 = vadd.f32 %v2343_v15, %v2033_v24 }
 0x5ed   : > { %v2039_v34 = vadd.f32 %v2343_v15, %v2031_v7 }
 0x5ee   : > { %2045 = vst [vmem:[%s3225_s10 + $0x18] sm:$0xff] %v2041_v17 }
 0x5ef   : > { %2043 = vst [vmem:[%s3225_s10 + $0x8] sm:$0xff] %v2039_v34 }
 0x5f0 PF: > { %s20_s13 = sadd.s32 1, %s2358_s13  }
 0x5f1   : > { %p17_p6 = scmp.ge.s32.totalorder %s20_s13, 4  }
 0x5f3   :  { %19 = sbr.rel (!%p17_p6) target bundleno = 1 (0x1), region = 106 }

</bundles_post_ra>
